<compile_context>
chip_gen: v7x
topology: tpu7x:2x2x1
jax: 0.10.0
libtpu: 0.0.40
codegen_flags: <defaults>
</compile_context>

<pallas_src>
import functools
import math

import jax
import jax.numpy as jnp
import numpy as np
from jax.experimental import pallas as pl
from jax.experimental.pallas import tpu as pltpu

# ---------------- configuration (small synthetic instance of Model) ----------------
FEATURE_NUM = 512          # synthetic backbone feature dim (real effnet-b0 would be 1280)
OUT_NUM = 128              # Model.out_num
CLASS_NUM = 10             # heads[0]
R_MIN, R_MAX = 1.0, 3.0    # heads_pool[0] == 'RGM1.0-3.0'
BN_EPS = 1e-5
DROPOUT_P = 0.2            # eval mode -> identity

BATCH, PATCH, CIMG, HIMG, WIMG = 2, 3, 3, 16, 16
DIN = CIMG * HIMG * WIMG


def _safe_pow(x, p):
    # pow for non-negative base, positive exponent (used in both kernel & reference
    # so numerics match): x**p == exp(p * log(x)), with 0**p -> 0.
    return jnp.exp(p * jnp.log(x))


# ---------------- fused kernel -------------------------------------------------------
def fused_kernel(x_ref, w_ref, mask_ref, r_ref, inv_r_ref, wh_ref, bh_ref, o_ref,
                 *, kernel_size, out_num, batch, patch):
    # x:     (N_pad, DIN)                   pixels on lanes (N_pad multiple of 8)
    # w:     (DIN, kernel_size*OUT_NUM)     BN-scale folded in; slot i of every pool
    #                                        window lives in lane chunk i*OUT_NUM:(i+1)*OUT_NUM
    # mask:  (1, kernel_size*OUT_NUM)       BN bias for valid slots, -inf for padded slots
    # r/inv_r: (1, OUT_NUM)                 GM-pool exponents and their reciprocals
    # wh: (OUT_NUM, CLASS_NUM), bh: (1, CLASS_NUM), o: (B, CLASS_NUM)

    # --- backbone + RealMaxPool1d + BatchNorm1d(eval, folded) + abs ---
    # One wide dot fills the 256-wide MXU (v6e/v7x) instead of 4 half-width passes.
    res = jnp.dot(x_ref[...], w_ref[...],
                  preferred_element_type=jnp.float32) + mask_ref[...]
    m = res[:, 0:out_num]
    for i in range(1, kernel_size):                 # 128-lane-aligned static slices
        m = jnp.maximum(m, res[:, i * out_num:(i + 1) * out_num])
    feats = jnp.abs(m)                              # (N_pad, OUT_NUM), rows >= B*P unused

    # --- PoolMultiRangeGM over patches (per-batch masked sublane reductions) ---
    n_pad = feats.shape[0]
    r = r_ref[...]
    inv_r = inv_r_ref[...]
    row_id = jax.lax.broadcasted_iota(jnp.int32, (n_pad, out_num), 0)

    pooled_rows = []
    for bi in range(batch):                         # tiny static loop (B=2)
        in_b = (row_id >= bi * patch) & (row_id < (bi + 1) * patch)
        alpha = jnp.max(jnp.where(in_b, feats, -jnp.inf), axis=0, keepdims=True)
        norm = feats / alpha                        # junk on rows outside batch bi (masked below)
        powered = jnp.where(in_b, _safe_pow(norm, r), 0.0)
        mean_p = jnp.sum(powered, axis=0, keepdims=True) * (1.0 / patch)
        pooled_rows.append(_safe_pow(mean_p, inv_r) * alpha)
    pooled = jnp.concatenate(pooled_rows, axis=0)   # (B, OUT_NUM)

    # --- Dropout (eval) == identity; classifier head Linear(OUT_NUM, CLASS_NUM) ---
    o_ref[...] = (jnp.dot(pooled, wh_ref[...], preferred_element_type=jnp.float32)
                  + bh_ref[...])


# ---------------- wrapper ------------------------------------------------------------
def model_forward(x, params):
    b, p = x.shape[0], x.shape[1]
    n = b * p
    n_pad = max(8, ((n + 7) // 8) * 8)              # (8,128)-aligned feature block
    x_flat = x.reshape(n, -1)                       # (B*P, 3*H*W)
    if n_pad != n:
        x_flat = jnp.pad(x_flat, ((0, n_pad - n), (0, 0)))

    vmem = lambda: pl.BlockSpec(memory_space=pltpu.MemorySpace.VMEM)

    kernel = functools.partial(
        fused_kernel,
        kernel_size=params["kernel_size"], out_num=OUT_NUM, batch=b, patch=p)

    logits = pl.pallas_call(
        kernel,
        out_shape=jax.ShapeDtypeStruct((b, CLASS_NUM), jnp.float32),
        in_specs=[vmem() for _ in range(7)],
        out_specs=vmem(),
    )(x_flat, params["w_all"], params["mask"], params["r"], params["inv_r"],
      params["w_head"], params["b_head"])
    return logits


# ---------------- pure-JAX reference (mirrors the torch forward) ---------------------
def reference_forward(x, w_backbone, r, w_head, b_head, kernel_size, padding):
    b, p = x.shape[:2]
    n = b * p
    xf = x.reshape(n, -1)
    feat = xf @ w_backbone                                   # synthetic backbone
    fp = jnp.pad(feat, ((0, 0), (padding, padding)), constant_values=-jnp.inf)
    nwin = (fp.shape[1] - kernel_size) // kernel_size + 1
    fp = fp[:, : nwin * kernel_size].reshape(n, nwin, kernel_size)
    pooled = fp.max(axis=-1)                                 # RealMaxPool1d
    bn = pooled / jnp.sqrt(1.0 + BN_EPS)                     # BatchNorm1d eval, affine=False
    feats = jnp.abs(bn).reshape(b, p, OUT_NUM)
    alpha = feats.max(axis=1, keepdims=True)
    norm = feats / alpha
    nout = _safe_pow(norm, r[None, :, :]).mean(axis=1)
    nout = _safe_pow(nout, 1.0 / r)
    pooled2 = nout * alpha[:, 0, :]
    return pooled2 @ w_head + b_head


if __name__ == "__main__":
    key = jax.random.PRNGKey(0)
    k1, k2, k3, k4 = jax.random.split(key, 4)

    # input: (batch, patch, 3, H, W)
    x = jax.random.normal(k1, (BATCH, PATCH, CIMG, HIMG, WIMG), jnp.float32)

    # make_end_part(FEATURE_NUM, OUT_NUM) arithmetic
    kernel_size = math.ceil(FEATURE_NUM / OUT_NUM)
    out_num_diff = OUT_NUM - math.floor(FEATURE_NUM / kernel_size)
    padding = 0
    while out_num_diff > 0:
        padding += 1
        out_num_diff = OUT_NUM - math.floor((FEATURE_NUM + 2 * padding) / kernel_size)
    assert out_num_diff == 0

    # deterministic parameter init
    w_backbone = (jax.random.normal(k2, (DIN, FEATURE_NUM), jnp.float32)
                  / np.sqrt(DIN)).astype(jnp.float32)
    w_head = (jax.random.normal(k3, (OUT_NUM, CLASS_NUM), jnp.float32)
              / np.sqrt(OUT_NUM)).astype(jnp.float32)
    b_head = (jax.random.normal(k4, (1, CLASS_NUM), jnp.float32) * 0.01).astype(jnp.float32)

    # PoolMultiRangeGM buffer r (r_min..r_max over OUT_NUM features) + host-side 1/r
    d = (R_MAX - R_MIN) / float(OUT_NUM)
    r = jnp.asarray([R_MIN + float(i) * d for i in range(OUT_NUM)],
                    jnp.float32).reshape(1, OUT_NUM)
    inv_r = 1.0 / r

    # BatchNorm1d(eval, affine=False) running stats folded into weights/bias:
    #   y = (maxpool - rm) * rsqrt(rv+eps)  ==  maxpool(w*scale . x) + (-rm*scale)
    rm = np.zeros(OUT_NUM, np.float32)
    rv = np.ones(OUT_NUM, np.float32)
    scale = (1.0 / np.sqrt(rv + BN_EPS)).astype(np.float32)
    bias = (-rm * scale).astype(np.float32)

    # wrapper-side layout plumbing: one wide weight matrix, pool-window slot i of
    # output column j lives at lane i*OUT_NUM + j; padded slots get -inf mask.
    wb_np = np.asarray(w_backbone)
    w_all = np.zeros((DIN, kernel_size * OUT_NUM), np.float32)
    mask = np.full((1, kernel_size * OUT_NUM), -np.inf, np.float32)
    for j in range(OUT_NUM):
        for i in range(kernel_size):
            col = j * kernel_size - padding + i
            if 0 <= col < FEATURE_NUM:
                w_all[:, i * OUT_NUM + j] = wb_np[:, col] * scale[j]
                mask[0, i * OUT_NUM + j] = bias[j]

    params = dict(
        kernel_size=kernel_size,
        w_all=jnp.asarray(w_all),
        mask=jnp.asarray(mask),
        r=r,
        inv_r=inv_r,
        w_head=w_head,
        b_head=b_head,
    )

    logits = model_forward(x, params)
    logits = jax.block_until_ready(logits)

    ref = reference_forward(x, w_backbone, r, w_head, b_head, kernel_size, padding)
    np.testing.assert_allclose(np.asarray(logits), np.asarray(ref), rtol=5e-3, atol=5e-3)

    print("KERNEL_OK")
</pallas_src>

<mosaic_0001>
module attributes {stable_mosaic.version = 11 : i64} {
  func.func @fused_kernel(%arg0: memref<8x768xf32, #tpu.memory_space<vmem>>, %arg1: memref<768x512xf32, #tpu.memory_space<vmem>>, %arg2: memref<1x512xf32, #tpu.memory_space<vmem>>, %arg3: memref<1x128xf32, #tpu.memory_space<vmem>>, %arg4: memref<1x128xf32, #tpu.memory_space<vmem>>, %arg5: memref<128x10xf32, #tpu.memory_space<vmem>>, %arg6: memref<1x10xf32, #tpu.memory_space<vmem>>, %arg7: memref<2x10xf32, #tpu.memory_space<vmem>>) attributes {dimension_semantics = [], scalar_prefetch = 0 : i64, scratch_operands = 0 : i64, tpu.core_type = #tpu.core_type<tc>} {
    %c0 = arith.constant 0 : index
    %c0_0 = arith.constant 0 : index
    %0 = vector.load %arg0[%c0, %c0_0] : memref<8x768xf32, #tpu.memory_space<vmem>>, vector<8x768xf32>
    %c0_1 = arith.constant 0 : index
    %c0_2 = arith.constant 0 : index
    %1 = vector.load %arg1[%c0_1, %c0_2] : memref<768x512xf32, #tpu.memory_space<vmem>>, vector<768x512xf32>
    %cst = arith.constant dense<0.000000e+00> : vector<8x512xf32>
    %2 = tpu.matmul %0, %1, %cst {dimension_numbers = #tpu.dot_dimension_numbers<[1], [0], [0], [1], [0, 0, 1, 1], [], []>} : vector<8x768xf32>, vector<768x512xf32>, vector<8x512xf32> -> vector<8x512xf32>
    %c0_3 = arith.constant 0 : index
    %c0_4 = arith.constant 0 : index
    %3 = vector.load %arg2[%c0_3, %c0_4] : memref<1x512xf32, #tpu.memory_space<vmem>>, vector<1x512xf32>
    %4 = vector.broadcast %3 : vector<1x512xf32> to vector<8x512xf32>
    %5 = arith.addf %2, %4 : vector<8x512xf32>
    %6 = vector.extract_strided_slice %5 {offsets = [0, 0], sizes = [8, 128], strides = [1, 1]} : vector<8x512xf32> to vector<8x128xf32>
    %7 = vector.extract_strided_slice %5 {offsets = [0, 128], sizes = [8, 128], strides = [1, 1]} : vector<8x512xf32> to vector<8x128xf32>
    %8 = arith.maximumf %6, %7 : vector<8x128xf32>
    %9 = vector.extract_strided_slice %5 {offsets = [0, 256], sizes = [8, 128], strides = [1, 1]} : vector<8x512xf32> to vector<8x128xf32>
    %10 = arith.maximumf %8, %9 : vector<8x128xf32>
    %11 = vector.extract_strided_slice %5 {offsets = [0, 384], sizes = [8, 128], strides = [1, 1]} : vector<8x512xf32> to vector<8x128xf32>
    %12 = arith.maximumf %10, %11 : vector<8x128xf32>
    %13 = math.absf %12 : vector<8x128xf32>
    %c0_5 = arith.constant 0 : index
    %c0_6 = arith.constant 0 : index
    %14 = vector.load %arg3[%c0_5, %c0_6] : memref<1x128xf32, #tpu.memory_space<vmem>>, vector<1x128xf32>
    %c0_7 = arith.constant 0 : index
    %c0_8 = arith.constant 0 : index
    %15 = vector.load %arg4[%c0_7, %c0_8] : memref<1x128xf32, #tpu.memory_space<vmem>>, vector<1x128xf32>
    %16 = tpu.iota {dimensions = array<i32: 0>} : vector<8x128xi32>
    %c0_i32 = arith.constant 0 : i32
    %17 = vector.broadcast %c0_i32 : i32 to vector<8x128xi32>
    %18 = arith.cmpi sge, %16, %17 : vector<8x128xi32>
    %c3_i32 = arith.constant 3 : i32
    %19 = vector.broadcast %c3_i32 : i32 to vector<8x128xi32>
    %20 = arith.cmpi slt, %16, %19 : vector<8x128xi32>
    %21 = arith.andi %18, %20 : vector<8x128xi1>
    %cst_9 = arith.constant 0xFF800000 : f32
    %22 = vector.broadcast %cst_9 : f32 to vector<8x128xf32>
    %23 = arith.select %21, %13, %22 : vector<8x128xi1>, vector<8x128xf32>
    %cst_10 = arith.constant dense<0xFF800000> : vector<128xf32>
    %24 = vector.multi_reduction <maximumf>, %23, %cst_10 [0] : vector<8x128xf32> to vector<128xf32>
    %25 = vector.shape_cast %24 : vector<128xf32> to vector<1x128xf32>
    %26 = vector.broadcast %25 : vector<1x128xf32> to vector<8x128xf32>
    %27 = arith.divf %13, %26 : vector<8x128xf32>
    %28 = math.log %27 : vector<8x128xf32>
    %29 = vector.broadcast %14 : vector<1x128xf32> to vector<8x128xf32>
    %30 = arith.mulf %29, %28 : vector<8x128xf32>
    %31 = math.exp %30 : vector<8x128xf32>
    %cst_11 = arith.constant 0.000000e+00 : f32
    %32 = vector.broadcast %cst_11 : f32 to vector<8x128xf32>
    %33 = arith.select %21, %31, %32 : vector<8x128xi1>, vector<8x128xf32>
    %cst_12 = arith.constant dense<0.000000e+00> : vector<128xf32>
    %34 = vector.multi_reduction <add>, %33, %cst_12 [0] : vector<8x128xf32> to vector<128xf32>
    %35 = vector.shape_cast %34 : vector<128xf32> to vector<1x128xf32>
    %cst_13 = arith.constant 0.333333343 : f32
    %36 = vector.broadcast %cst_13 : f32 to vector<1x128xf32>
    %37 = arith.mulf %35, %36 : vector<1x128xf32>
    %38 = math.log %37 : vector<1x128xf32>
    %39 = arith.mulf %15, %38 : vector<1x128xf32>
    %40 = math.exp %39 : vector<1x128xf32>
    %41 = arith.mulf %40, %25 : vector<1x128xf32>
    %c3_i32_14 = arith.constant 3 : i32
    %42 = vector.broadcast %c3_i32_14 : i32 to vector<8x128xi32>
    %43 = arith.cmpi sge, %16, %42 : vector<8x128xi32>
    %c6_i32 = arith.constant 6 : i32
    %44 = vector.broadcast %c6_i32 : i32 to vector<8x128xi32>
    %45 = arith.cmpi slt, %16, %44 : vector<8x128xi32>
    %46 = arith.andi %43, %45 : vector<8x128xi1>
    %cst_15 = arith.constant 0xFF800000 : f32
    %47 = vector.broadcast %cst_15 : f32 to vector<8x128xf32>
    %48 = arith.select %46, %13, %47 : vector<8x128xi1>, vector<8x128xf32>
    %cst_16 = arith.constant dense<0xFF800000> : vector<128xf32>
    %49 = vector.multi_reduction <maximumf>, %48, %cst_16 [0] : vector<8x128xf32> to vector<128xf32>
    %50 = vector.shape_cast %49 : vector<128xf32> to vector<1x128xf32>
    %51 = vector.broadcast %50 : vector<1x128xf32> to vector<8x128xf32>
    %52 = arith.divf %13, %51 : vector<8x128xf32>
    %53 = math.log %52 : vector<8x128xf32>
    %54 = vector.broadcast %14 : vector<1x128xf32> to vector<8x128xf32>
    %55 = arith.mulf %54, %53 : vector<8x128xf32>
    %56 = math.exp %55 : vector<8x128xf32>
    %cst_17 = arith.constant 0.000000e+00 : f32
    %57 = vector.broadcast %cst_17 : f32 to vector<8x128xf32>
    %58 = arith.select %46, %56, %57 : vector<8x128xi1>, vector<8x128xf32>
    %cst_18 = arith.constant dense<0.000000e+00> : vector<128xf32>
    %59 = vector.multi_reduction <add>, %58, %cst_18 [0] : vector<8x128xf32> to vector<128xf32>
    %60 = vector.shape_cast %59 : vector<128xf32> to vector<1x128xf32>
    %cst_19 = arith.constant 0.333333343 : f32
    %61 = vector.broadcast %cst_19 : f32 to vector<1x128xf32>
    %62 = arith.mulf %60, %61 : vector<1x128xf32>
    %63 = math.log %62 : vector<1x128xf32>
    %64 = arith.mulf %15, %63 : vector<1x128xf32>
    %65 = math.exp %64 : vector<1x128xf32>
    %66 = arith.mulf %65, %50 : vector<1x128xf32>
    %67 = tpu.concatenate %41, %66 in 0 : vector<1x128xf32>, vector<1x128xf32> -> vector<2x128xf32>
    %c0_20 = arith.constant 0 : index
    %c0_21 = arith.constant 0 : index
    %68 = vector.load %arg5[%c0_20, %c0_21] : memref<128x10xf32, #tpu.memory_space<vmem>>, vector<128x10xf32>
    %cst_22 = arith.constant dense<0.000000e+00> : vector<2x10xf32>
    %69 = tpu.matmul %67, %68, %cst_22 {dimension_numbers = #tpu.dot_dimension_numbers<[1], [0], [0], [1], [0, 0, 1, 1], [], []>} : vector<2x128xf32>, vector<128x10xf32>, vector<2x10xf32> -> vector<2x10xf32>
    %c0_23 = arith.constant 0 : index
    %c0_24 = arith.constant 0 : index
    %70 = vector.load %arg6[%c0_23, %c0_24] : memref<1x10xf32, #tpu.memory_space<vmem>>, vector<1x10xf32>
    %71 = vector.broadcast %70 : vector<1x10xf32> to vector<2x10xf32>
    %72 = arith.addf %69, %71 : vector<2x10xf32>
    %c0_25 = arith.constant 0 : index
    %c0_26 = arith.constant 0 : index
    %73 = vector.load %arg7[%c0_25, %c0_26] : memref<2x10xf32, #tpu.memory_space<vmem>>, vector<2x10xf32>
    tpu.vector_store %arg7[%c0_25, %c0_26], %72 {strides = array<i32>} : memref<2x10xf32, #tpu.memory_space<vmem>>, vector<2x10xf32>,
    return
  }
}

</mosaic_0001>

<bundles_post_ra>
// kernel: tpu_custom_call.1
= control target key start
LH: loop header
LB: loop body
LE: loop exit
PB: predicated region body
PF: predicated region fallthrough
CT: control target
= control target key end

     0   :  { %12 = vsyncpa [#allocation3], 0  ;;  %s2013_s0 = inlined_call_operand.hbm [shape: f32[8,768], index: 0, kind: input, shape index: {}]   ;;  %s2014_s1 = inlined_call_operand.hbm [shape: f32[768,512], index: 1, kind: input, shape index: {}]   ;;  %s2015_s2 = inlined_call_operand.hbm [shape: f32[1,512], index: 2, kind: input, shape index: {}]   ;;  %s2016_s3 = inlined_call_operand.hbm [shape: f32[1,128], index: 3, kind: input, shape index: {}]   ;;  %s2017_s4 = inlined_call_operand.hbm [shape: f32[1,128], index: 4, kind: input, shape index: {}]   ;;  %s2018_s5 = inlined_call_operand.vmem [shape: f32[128,10], index: 5, kind: input, shape index: {}]   ;;  %s2019_s6 = inlined_call_operand.hbm [shape: f32[1,10], index: 6, kind: input, shape index: {}]   ;;  %s2020_s7 = inlined_call_operand.hbm [shape: f32[2,10], index: 7, kind: output, shape index: {}]  }
   0x1   :  { %13 = vsyncpa [#allocation6], 0 }
   0x2   :  { %14 = vsyncpa [#allocation9], 0 }
   0x3   :  { %15 = vsyncpa [#allocation12], 0 }
   0x4   :  { %16 = vsyncpa [#allocation4], 0  ;;  %s1804_s24 = smov [#allocation5]   ;;  %s1640_s28 = scalar_lea.hbm %s2014_s1, 49152 }
   0x5   :  { %s32_s25 = sshll.u32 %s1804_s24, 4  ;;  %p1641_p0 = scmp.ne.s32.totalorder %s2014_s1, %s1640_s28  ;;  %s33_s25 = int_to_ptr.vmem [resolvable:$true] %s32_s25 }
   0x6   :  { %p1644_p1 = scmp.lt.u32.totalorder %s1640_s28, %s2014_s1 }
   0x8   :  { %p1646_p2 = pnand %p1644_p1, %p1641_p0 }
   0xa   :  { %1649 = shalt.err (!%p1646_p2)
}
   0xb   :  { %s1650_s10 = scalar_lea.vmem %s33_s25, 49152  ;;  %p1655_p4 = scmp.lt.s32.totalorder %s33_s25, %s33_s25 }
   0xc   :  { %p1651_p3 = scmp.ne.s32.totalorder %s33_s25, %s1650_s10  ;;  %p1656_p5 = scmp.lt.s32.totalorder %s1650_s10, %s1650_s10 }
   0xe   :  { %p1657_p6 = por %p1656_p5, %p1655_p4 }
  0x10   :  { %p1658_p7 = pnand %p1657_p6, %p1651_p3 }
  0x12   :  { %1661 = shalt.err (!%p1658_p7)
}
  0x13   :  { %s1805_s11 = smov 512   ;;  %s1806_s12 = smov 32  }
  0x14   :  { %38 = dma.hbm_to_vmem [thread:$0]  %s2014_s1, 49152, %s33_s25, [#allocation6], %s1805_s11, %s1805_s11, %s1806_s12  }
  0x15   :  { %s1807_s15 = smov [#allocation8]   ;;  %s1808_s17 = smov [#allocation2]  }
  0x16   :  { %s55_s16 = sshll.u32 %s1807_s15, 4  ;;  %s23_s18 = sshll.u32 %s1808_s17, 4  ;;  %s56_s16 = int_to_ptr.vmem [resolvable:$true] %s55_s16  ;;  %s24_s18 = int_to_ptr.vmem [resolvable:$true] %s23_s18 }
  0x17   :  { %s1662_s21 = scalar_lea.hbm %s2016_s3, 16 }
  0x18   :  { %p1663_p8 = scmp.ne.s32.totalorder %s2016_s3, %s1662_s21  ;;  %p1666_p9 = scmp.lt.u32.totalorder %s1662_s21, %s2016_s3 }
  0x1a   :  { %p1668_p10 = pnand %p1666_p9, %p1663_p8 }
  0x1c   :  { %1671 = shalt.err (!%p1668_p10)
}
  0x1d   :  { %s1672_s1 = scalar_lea.vmem %s56_s16, 16  ;;  %s1676_s25 = scalar_lea.vmem %s56_s16, 32 }
  0x1e   :  { %p1673_p11 = scmp.ne.s32.totalorder %s56_s16, %s1672_s1  ;;  %p1677_p12 = scmp.lt.s32.totalorder %s56_s16, %s56_s16 }
  0x1f   :  { %p1678_p13 = scmp.lt.s32.totalorder %s1676_s25, %s1672_s1 }
  0x21   :  { %p1679_p0 = por %p1678_p13, %p1677_p12 }
  0x23   :  { %p1680_p1 = pnand %p1679_p0, %p1673_p11 }
  0x25   :  { %1683 = shalt.err (!%p1680_p1)
}
  0x26   :  { %58 = dma.hbm_to_vmem [thread:$0]  %s2016_s3, 16, %s56_s16, [#allocation9]  }
  0x27   :  { %s1684_s8 = scalar_lea.hbm %s2013_s0, 768 }
  0x28   :  { %p1685_p2 = scmp.ne.s32.totalorder %s2013_s0, %s1684_s8  ;;  %p1688_p3 = scmp.lt.u32.totalorder %s1684_s8, %s2013_s0 }
  0x2a   :  { %p1690_p4 = pnand %p1688_p3, %p1685_p2 }
  0x2c   :  { %1693 = shalt.err (!%p1690_p4)
}
  0x2d   :  { %s1694_s13 = scalar_lea.vmem %s24_s18, 768  ;;  %p1699_p6 = scmp.lt.s32.totalorder %s24_s18, %s24_s18 }
  0x2e   :  { %p1695_p5 = scmp.ne.s32.totalorder %s24_s18, %s1694_s13  ;;  %p1700_p7 = scmp.lt.s32.totalorder %s1694_s13, %s1694_s13 }
  0x30   :  { %p1701_p8 = por %p1700_p7, %p1699_p6 }
  0x32   :  { %p1702_p9 = pnand %p1701_p8, %p1695_p5 }
  0x34   :  { %1705 = shalt.err (!%p1702_p9)
}
  0x35   :  { %26 = dma.hbm_to_vmem [thread:$0]  %s2013_s0, 768, %s24_s18, [#allocation3]  }
  0x36   :  { %s1809_s15 = smov [#allocation7]   ;;  %s1810_s17 = smov [#allocation10]  }
  0x37   :  { %s45_s16 = sshll.u32 %s1809_s15, 4  ;;  %s65_s19 = sshll.u32 %s1810_s17, 4  ;;  %s46_s16 = int_to_ptr.vmem [resolvable:$true] %s45_s16  ;;  %s66_s19 = int_to_ptr.vmem [resolvable:$true] %s65_s19 }
  0x38   :  { %s1706_s22 = scalar_lea.hbm %s2015_s2, 64 }
  0x39   :  { %p1707_p10 = scmp.ne.s32.totalorder %s2015_s2, %s1706_s22  ;;  %p1710_p11 = scmp.lt.u32.totalorder %s1706_s22, %s2015_s2 }
  0x3b   :  { %p1712_p12 = pnand %p1710_p11, %p1707_p10 }
  0x3d   :  { %1715 = shalt.err (!%p1712_p12)
}
  0x3e   :  { %s1716_s0 = scalar_lea.vmem %s46_s16, 64  ;;  %p1721_p0 = scmp.lt.s32.totalorder %s46_s16, %s46_s16 }
  0x3f   :  { %p1717_p13 = scmp.ne.s32.totalorder %s46_s16, %s1716_s0  ;;  %p1722_p1 = scmp.lt.s32.totalorder %s1716_s0, %s1716_s0 }
  0x41   :  { %p1723_p2 = por %p1722_p1, %p1721_p0 }
  0x43   :  { %p1724_p3 = pnand %p1723_p2, %p1717_p13 }
  0x45   :  { %1727 = shalt.err (!%p1724_p3)
}
  0x46   :  { %48 = dma.hbm_to_vmem [thread:$0]  %s2015_s2, 64, %s46_s16, [#allocation6]  }
  0x47   :  { %s1728_s29 = scalar_lea.hbm %s2017_s4, 16 }
  0x48   :  { %p1729_p4 = scmp.ne.s32.totalorder %s2017_s4, %s1728_s29  ;;  %p1732_p5 = scmp.lt.u32.totalorder %s1728_s29, %s2017_s4 }
  0x4a   :  { %p1734_p6 = pnand %p1732_p5, %p1729_p4 }
  0x4c   :  { %1737 = shalt.err (!%p1734_p6)
}
  0x4d   :  { %s1738_s11 = scalar_lea.vmem %s66_s19, 16  ;;  %s1742_s12 = scalar_lea.vmem %s66_s19, 32 }
  0x4e   :  { %p1739_p7 = scmp.ne.s32.totalorder %s66_s19, %s1738_s11  ;;  %p1743_p8 = scmp.lt.s32.totalorder %s66_s19, %s66_s19 }
  0x4f   :  { %p1744_p9 = scmp.lt.s32.totalorder %s1742_s12, %s1738_s11 }
  0x51   :  { %p1745_p10 = por %p1744_p9, %p1743_p8 }
  0x53   :  { %p1746_p11 = pnand %p1745_p10, %p1739_p7 }
  0x55   :  { %1749 = shalt.err (!%p1746_p11)
}
  0x56   :  { %68 = dma.hbm_to_vmem [thread:$0]  %s2017_s4, 16, %s66_s19, [#allocation9]  }
  0x57   :  { %s1811_s3 = smov [#allocation11]   ;;  %s1750_s17 = scalar_lea.hbm %s2019_s6, 16 }
  0x58   :  { %s77_s14 = sshll.u32 %s1811_s3, 4  ;;  %p1751_p12 = scmp.ne.s32.totalorder %s2019_s6, %s1750_s17  ;;  %s78_s14 = int_to_ptr.vmem [resolvable:$true] %s77_s14 }
  0x59   :  { %p1754_p13 = scmp.lt.u32.totalorder %s1750_s17, %s2019_s6 }
  0x5b   :  { %p1756_p0 = pnand %p1754_p13, %p1751_p12 }
  0x5d   :  { %1759 = shalt.err (!%p1756_p0)
}
  0x5e   :  { %s1760_s24 = scalar_lea.vmem %s78_s14, 16  ;;  %s1764_s4 = scalar_lea.vmem %s78_s14, 32 }
  0x5f   :  { %p1761_p1 = scmp.ne.s32.totalorder %s78_s14, %s1760_s24  ;;  %p1765_p2 = scmp.lt.s32.totalorder %s78_s14, %s78_s14 }
  0x60   :  { %p1766_p3 = scmp.lt.s32.totalorder %s1764_s4, %s1760_s24 }
  0x62   :  { %p1767_p4 = por %p1766_p3, %p1765_p2 }
  0x64   :  { %p1768_p5 = pnand %p1767_p4, %p1761_p1 }
  0x66   :  { %1771 = shalt.err (!%p1768_p5)
}
  0x67   :  { %80 = dma.hbm_to_vmem [thread:$0]  %s2019_s6, 16, %s78_s14, [#allocation12]  }
  0x68   :  { %1794 = dma.done.wait [#allocation3], 768  }
  0x69   :  { %1795 = vsyncadd [#allocation3], 4294966528 }
  0x6a   :  { %1796 = dma.done.wait [#allocation6], 49216  }
  0x6b   :  { %1797 = vsyncadd [#allocation6], 4294918080 }
  0x6c   :  { %1798 = dma.done.wait [#allocation9], 32  }
  0x6d   :  { %1799 = vsyncadd [#allocation9], 4294967264 }
  0x6e   :  { %1800 = dma.done.wait [#allocation12], 16  }
  0x6f   :  { %1801 = vsyncadd [#allocation12], 4294967280  ;;  %v106_v0 = vld [vmem:[#allocation5 + $0x8] sm:$0xff]  ;;  %v108_v2 = vld [vmem:[#allocation5 + $0x18] sm:$0xff]  ;;  %vm1813_vm0 = vmmov 0   ;;  %vm1019_vm5 = vcmask 1040384  }
  0x70   :  { %v110_v1 = vld [vmem:[#allocation5 + $0x28] sm:$0xff]  ;;  %v112_v4 = vld [vmem:[#allocation5 + $0x38] sm:$0xff]  ;;  %v105_v5 = vld [vmem:[#allocation5] sm:$0xff]  ;;  %vm1114_vm6 = vcmask 74752  }
  0x71   :  { %v1188_v3 = vpack.c.bf16 %v110_v1, %v106_v0  ;;  %v109_v6 = vld [vmem:[#allocation5 + $0x20] sm:$0xff]  ;;  %v1380_v7 = vpack.c.bf16 %v112_v4, %v108_v2  ;;  %v107_v9 = vld [vmem:[#allocation5 + $0x10] sm:$0xff]  ;;  %v114_v11 = vld [vmem:[#allocation5 + $0x48] sm:$0xff] }
  0x72   :  { %v1190_v8 = vpack.c.bf16 %v109_v6, %v105_v5  ;;  %v111_v10 = vld [vmem:[#allocation5 + $0x30] sm:$0xff]  ;;  %v118_v13 = vld [vmem:[#allocation5 + $0x68] sm:$0xff]  ;;  %v116_v14 = vld [vmem:[#allocation5 + $0x58] sm:$0xff] }
  0x73   :  { %1189 = vmatprep.subr.bf16.mxu0 %v1188_v3  ;;  %v1382_v12 = vpack.c.bf16 %v111_v10, %v107_v9  ;;  %v120_v15 = vld [vmem:[#allocation5 + $0x78] sm:$0xff]  ;;  %1381 = vmatprep.subr.bf16.mxu1 %v1380_v7  ;;  %v1192_v16 = vpack.c.bf16 %v118_v13, %v114_v11  ;;  %v113_v18 = vld [vmem:[#allocation5 + $0x40] sm:$0xff]  ;;  %v115_v20 = vld [vmem:[#allocation5 + $0x50] sm:$0xff] }
  0x74   :  { %1191 = vmatpush1.bf16.msra.mxu0 %v1190_v8  ;;  %v1384_v17 = vpack.c.bf16 %v120_v15, %v116_v14  ;;  %v117_v19 = vld [vmem:[#allocation5 + $0x60] sm:$0xff]  ;;  %v119_v22 = vld [vmem:[#allocation5 + $0x70] sm:$0xff]  ;;  %v122_v23 = vld [vmem:[#allocation5 + $0x88] sm:$0xff] }
  0x75   :  { %1383 = vmatpush1.bf16.msra.mxu1 %v1382_v12  ;;  %v1194_v21 = vpack.c.bf16 %v117_v19, %v113_v18  ;;  %v126_v24 = vld [vmem:[#allocation5 + $0xa8] sm:$0xff]  ;;  %1193 = vmatprep.subr.bf16.mxu0 %v1192_v16  ;;  %v1386_v25 = vpack.c.bf16 %v119_v22, %v115_v20  ;;  %v124_v27 = vld [vmem:[#allocation5 + $0x98] sm:$0xff]  ;;  %v121_v29 = vld [vmem:[#allocation5 + $0x80] sm:$0xff] }
  0x76   :  { %1385 = vmatprep.subr.bf16.mxu1 %v1384_v17  ;;  %v1196_v26 = vpack.c.bf16 %v126_v24, %v122_v23  ;;  %v128_v28 = vld [vmem:[#allocation5 + $0xb8] sm:$0xff]  ;;  %v125_v31 = vld [vmem:[#allocation5 + $0xa0] sm:$0xff]  ;;  %v123_v32 = vld [vmem:[#allocation5 + $0x90] sm:$0xff] }
  0x77   :  { %v1388_v30 = vpack.c.bf16 %v128_v28, %v124_v27  ;;  %v127_v33 = vld [vmem:[#allocation5 + $0xb0] sm:$0xff]  ;;  %v1198_v34 = vpack.c.bf16 %v125_v31, %v121_v29  ;;  %v130_v35 = vld [vmem:[#allocation5 + $0xc8] sm:$0xff]  ;;  %v132_v37 = vld [vmem:[#allocation5 + $0xd8] sm:$0xff] }
  0x78   :  { %1195 = vmatpush1.bf16.msra.mxu0 %v1194_v21  ;;  %v134_v36 = vld [vmem:[#allocation5 + $0xe8] sm:$0xff]  ;;  %v1390_v38 = vpack.c.bf16 %v127_v33, %v123_v32  ;;  %v136_v40 = vld [vmem:[#allocation5 + $0xf8] sm:$0xff]  ;;  %v129_v41 = vld [vmem:[#allocation5 + $0xc0] sm:$0xff] }
  0x79   :  { %1387 = vmatpush1.bf16.msra.mxu1 %v1386_v25  ;;  %1197 = vmatprep.subr.bf16.mxu0 %v1196_v26  ;;  %v1200_v39 = vpack.c.bf16 %v134_v36, %v130_v35  ;;  %v133_v42 = vld [vmem:[#allocation5 + $0xe0] sm:$0xff]  ;;  %v1392_v43 = vpack.c.bf16 %v136_v40, %v132_v37  ;;  %v131_v44 = vld [vmem:[#allocation5 + $0xd0] sm:$0xff]  ;;  %v138_v46 = vld [vmem:[#allocation5 + $0x108] sm:$0xff] }
  0x7a   :  { %1389 = vmatprep.subr.bf16.mxu1 %v1388_v30  ;;  %v135_v45 = vld [vmem:[#allocation5 + $0xf0] sm:$0xff]  ;;  %v142_v47 = vld [vmem:[#allocation5 + $0x128] sm:$0xff]  ;;  %v140_v48 = vld [vmem:[#allocation5 + $0x118] sm:$0xff]  ;;  %v1202_v50 = vpack.c.bf16 %v133_v42, %v129_v41 }
  0x7b   :  { %v144_v49 = vld [vmem:[#allocation5 + $0x138] sm:$0xff]  ;;  %v1394_v51 = vpack.c.bf16 %v135_v45, %v131_v44  ;;  %v1204_v52 = vpack.c.bf16 %v142_v47, %v138_v46  ;;  %v137_v53 = vld [vmem:[#allocation5 + $0x100] sm:$0xff]  ;;  %v139_v55 = vld [vmem:[#allocation5 + $0x110] sm:$0xff] }
  0x7c   :  { %1199 = vmatpush1.bf16.msra.mxu0 %v1198_v34  ;;  %v141_v54 = vld [vmem:[#allocation5 + $0x120] sm:$0xff]  ;;  %v1396_v56 = vpack.c.bf16 %v144_v49, %v140_v48  ;;  %v143_v57 = vld [vmem:[#allocation5 + $0x130] sm:$0xff]  ;;  %v146_v58 = vld [vmem:[#allocation5 + $0x148] sm:$0xff] }
  0x7d   :  { %1391 = vmatpush1.bf16.msra.mxu1 %v1390_v38  ;;  %1201 = vmatprep.subr.bf16.mxu0 %v1200_v39  ;;  %v150_v59 = vld [vmem:[#allocation5 + $0x168] sm:$0xff]  ;;  %v148_v60 = vld [vmem:[#allocation5 + $0x158] sm:$0xff]  ;;  %v1206_v62 = vpack.c.bf16 %v141_v54, %v137_v53  ;;  %v1398_v63 = vpack.c.bf16 %v143_v57, %v139_v55  ;;  %v145_v1 = vld [vmem:[#allocation5 + $0x140] sm:$0xff] }
  0x7e   :  { %1393 = vmatprep.subr.bf16.mxu1 %v1392_v43  ;;  %v152_v61 = vld [vmem:[#allocation5 + $0x178] sm:$0xff]  ;;  %v1208_v0 = vpack.c.bf16 %v150_v59, %v146_v58  ;;  %v149_v2 = vld [vmem:[#allocation5 + $0x160] sm:$0xff]  ;;  %v147_v3 = vld [vmem:[#allocation5 + $0x150] sm:$0xff] }
  0x7f   :  { %v1400_v4 = vpack.c.bf16 %v152_v61, %v148_v60  ;;  %v151_v5 = vld [vmem:[#allocation5 + $0x170] sm:$0xff]  ;;  %v154_v6 = vld [vmem:[#allocation5 + $0x188] sm:$0xff]  ;;  %v156_v8 = vld [vmem:[#allocation5 + $0x198] sm:$0xff]  ;;  %v1210_v10 = vpack.c.bf16 %v149_v2, %v145_v1 }
  0x80   :  { %1203 = vmatpush1.bf16.msra.mxu0 %v1202_v50  ;;  %v158_v7 = vld [vmem:[#allocation5 + $0x1a8] sm:$0xff]  ;;  %v160_v9 = vld [vmem:[#allocation5 + $0x1b8] sm:$0xff]  ;;  %v1402_v11 = vpack.c.bf16 %v151_v5, %v147_v3  ;;  %v153_v13 = vld [vmem:[#allocation5 + $0x180] sm:$0xff] }
  0x81   :  { %1395 = vmatpush1.bf16.msra.mxu1 %v1394_v51  ;;  %1205 = vmatprep.subr.bf16.mxu0 %v1204_v52  ;;  %v1212_v12 = vpack.c.bf16 %v158_v7, %v154_v6  ;;  %v157_v14 = vld [vmem:[#allocation5 + $0x1a0] sm:$0xff]  ;;  %v155_v15 = vld [vmem:[#allocation5 + $0x190] sm:$0xff]  ;;  %v1404_v16 = vpack.c.bf16 %v160_v9, %v156_v8  ;;  %v162_v18 = vld [vmem:[#allocation5 + $0x1c8] sm:$0xff] }
  0x82   :  { %1397 = vmatprep.subr.bf16.mxu1 %v1396_v56  ;;  %v159_v17 = vld [vmem:[#allocation5 + $0x1b0] sm:$0xff]  ;;  %v166_v19 = vld [vmem:[#allocation5 + $0x1e8] sm:$0xff]  ;;  %v164_v20 = vld [vmem:[#allocation5 + $0x1d8] sm:$0xff]  ;;  %v1214_v22 = vpack.c.bf16 %v157_v14, %v153_v13 }
  0x83   :  { %v168_v21 = vld [vmem:[#allocation5 + $0x1f8] sm:$0xff]  ;;  %v1406_v23 = vpack.c.bf16 %v159_v17, %v155_v15  ;;  %v1216_v24 = vpack.c.bf16 %v166_v19, %v162_v18  ;;  %v161_v25 = vld [vmem:[#allocation5 + $0x1c0] sm:$0xff]  ;;  %v163_v27 = vld [vmem:[#allocation5 + $0x1d0] sm:$0xff] }
  0x84   :  { %1207 = vmatpush1.bf16.msra.mxu0 %v1206_v62  ;;  %v165_v26 = vld [vmem:[#allocation5 + $0x1e0] sm:$0xff]  ;;  %v1408_v28 = vpack.c.bf16 %v168_v21, %v164_v20  ;;  %v167_v29 = vld [vmem:[#allocation5 + $0x1f0] sm:$0xff]  ;;  %v170_v30 = vld [vmem:[#allocation5 + $0x208] sm:$0xff] }
  0x85   :  { %1399 = vmatpush1.bf16.msra.mxu1 %v1398_v63  ;;  %1209 = vmatprep.subr.bf16.mxu0 %v1208_v0  ;;  %v174_v31 = vld [vmem:[#allocation5 + $0x228] sm:$0xff]  ;;  %v172_v32 = vld [vmem:[#allocation5 + $0x218] sm:$0xff]  ;;  %v1218_v34 = vpack.c.bf16 %v165_v26, %v161_v25  ;;  %v1410_v35 = vpack.c.bf16 %v167_v29, %v163_v27  ;;  %v169_v37 = vld [vmem:[#allocation5 + $0x200] sm:$0xff] }
  0x86   :  { %1401 = vmatprep.subr.bf16.mxu1 %v1400_v4  ;;  %v176_v33 = vld [vmem:[#allocation5 + $0x238] sm:$0xff]  ;;  %v1220_v36 = vpack.c.bf16 %v174_v31, %v170_v30  ;;  %v173_v38 = vld [vmem:[#allocation5 + $0x220] sm:$0xff]  ;;  %v171_v39 = vld [vmem:[#allocation5 + $0x210] sm:$0xff] }
  0x87   :  { %v1412_v40 = vpack.c.bf16 %v176_v33, %v172_v32  ;;  %v175_v41 = vld [vmem:[#allocation5 + $0x230] sm:$0xff]  ;;  %v178_v42 = vld [vmem:[#allocation5 + $0x248] sm:$0xff]  ;;  %v180_v44 = vld [vmem:[#allocation5 + $0x258] sm:$0xff]  ;;  %v1222_v46 = vpack.c.bf16 %v173_v38, %v169_v37 }
  0x88   :  { %1211 = vmatpush1.bf16.msra.mxu0 %v1210_v10  ;;  %v182_v43 = vld [vmem:[#allocation5 + $0x268] sm:$0xff]  ;;  %v184_v45 = vld [vmem:[#allocation5 + $0x278] sm:$0xff]  ;;  %v1414_v47 = vpack.c.bf16 %v175_v41, %v171_v39  ;;  %v177_v49 = vld [vmem:[#allocation5 + $0x240] sm:$0xff] }
  0x89   :  { %1403 = vmatpush1.bf16.msra.mxu1 %v1402_v11  ;;  %1213 = vmatprep.subr.bf16.mxu0 %v1212_v12  ;;  %v1224_v48 = vpack.c.bf16 %v182_v43, %v178_v42  ;;  %v181_v50 = vld [vmem:[#allocation5 + $0x260] sm:$0xff]  ;;  %v179_v51 = vld [vmem:[#allocation5 + $0x250] sm:$0xff]  ;;  %v1416_v52 = vpack.c.bf16 %v184_v45, %v180_v44  ;;  %v186_v54 = vld [vmem:[#allocation5 + $0x288] sm:$0xff] }
  0x8a   :  { %1405 = vmatprep.subr.bf16.mxu1 %v1404_v16  ;;  %v183_v53 = vld [vmem:[#allocation5 + $0x270] sm:$0xff]  ;;  %v190_v55 = vld [vmem:[#allocation5 + $0x2a8] sm:$0xff]  ;;  %v188_v56 = vld [vmem:[#allocation5 + $0x298] sm:$0xff]  ;;  %v1226_v58 = vpack.c.bf16 %v181_v50, %v177_v49 }
  0x8b   :  { %v192_v57 = vld [vmem:[#allocation5 + $0x2b8] sm:$0xff]  ;;  %v1418_v59 = vpack.c.bf16 %v183_v53, %v179_v51  ;;  %v1228_v60 = vpack.c.bf16 %v190_v55, %v186_v54  ;;  %v185_v61 = vld [vmem:[#allocation5 + $0x280] sm:$0xff]  ;;  %v187_v63 = vld [vmem:[#allocation5 + $0x290] sm:$0xff] }
  0x8c   :  { %1215 = vmatpush1.bf16.msra.mxu0 %v1214_v22  ;;  %v189_v62 = vld [vmem:[#allocation5 + $0x2a0] sm:$0xff]  ;;  %v1420_v0 = vpack.c.bf16 %v192_v57, %v188_v56  ;;  %v191_v1 = vld [vmem:[#allocation5 + $0x2b0] sm:$0xff]  ;;  %v194_v2 = vld [vmem:[#allocation5 + $0x2c8] sm:$0xff] }
  0x8d   :  { %1407 = vmatpush1.bf16.msra.mxu1 %v1406_v23  ;;  %1217 = vmatprep.subr.bf16.mxu0 %v1216_v24  ;;  %v198_v3 = vld [vmem:[#allocation5 + $0x2e8] sm:$0xff]  ;;  %v196_v4 = vld [vmem:[#allocation5 + $0x2d8] sm:$0xff]  ;;  %v1230_v6 = vpack.c.bf16 %v189_v62, %v185_v61  ;;  %v193_v7 = vld [vmem:[#allocation5 + $0x2c0] sm:$0xff]  ;;  %v1422_v8 = vpack.c.bf16 %v191_v1, %v187_v63 }
  0x8e   :  { %1409 = vmatprep.subr.bf16.mxu1 %v1408_v28  ;;  %v200_v5 = vld [vmem:[#allocation5 + $0x2f8] sm:$0xff]  ;;  %v1232_v9 = vpack.c.bf16 %v198_v3, %v194_v2  ;;  %v197_v10 = vld [vmem:[#allocation5 + $0x2e0] sm:$0xff]  ;;  %v195_v11 = vld [vmem:[#allocation5 + $0x2d0] sm:$0xff] }
  0x8f   :  { %v199_v12 = vld [vmem:[#allocation5 + $0x2f0] sm:$0xff]  ;;  %v1424_v13 = vpack.c.bf16 %v200_v5, %v196_v4  ;;  %v202_v14 = vld [vmem:[#allocation5 + $0x308] sm:$0xff]  ;;  %v100_v16 = vld [vmem:[#allocation2 + $0x8] sm:$0xff]  ;;  %v1234_v19 = vpack.c.bf16 %v197_v10, %v193_v7 }
  0x90   :  { %1219 = vmatpush1.bf16.msra.mxu0 %v1218_v34  ;;  %v206_v15 = vld [vmem:[#allocation5 + $0x328] sm:$0xff]  ;;  %v204_v17 = vld [vmem:[#allocation5 + $0x318] sm:$0xff]  ;;  %575 = vmatprep.mubr.f32.mxu0 %v100_v16  ;;  %v1426_v20 = vpack.c.bf16 %v199_v12, %v195_v11  ;;  %v201_v22 = vld [vmem:[#allocation5 + $0x300] sm:$0xff] }
  0x91   :  { %1411 = vmatpush1.bf16.msra.mxu1 %v1410_v35  ;;  %1221 = vmatprep.subr.bf16.mxu0 %v1220_v36  ;;  %v208_v18 = vld [vmem:[#allocation5 + $0x338] sm:$0xff]  ;;  %v1236_v21 = vpack.c.bf16 %v206_v15, %v202_v14  ;;  %v205_v23 = vld [vmem:[#allocation5 + $0x320] sm:$0xff]  ;;  %v203_v24 = vld [vmem:[#allocation5 + $0x310] sm:$0xff] }
  0x92   :  { %1413 = vmatprep.subr.bf16.mxu1 %v1412_v40  ;;  %788 = vmatprep.mubr.f32.mxu1 %v100_v16  ;;  %v1428_v25 = vpack.c.bf16 %v208_v18, %v204_v17  ;;  %v207_v26 = vld [vmem:[#allocation5 + $0x330] sm:$0xff]  ;;  %v210_v27 = vld [vmem:[#allocation5 + $0x348] sm:$0xff]  ;;  %v212_v29 = vld [vmem:[#allocation5 + $0x358] sm:$0xff]  ;;  %v1238_v31 = vpack.c.bf16 %v205_v23, %v201_v22 }
  0x93   :  { %v214_v28 = vld [vmem:[#allocation5 + $0x368] sm:$0xff]  ;;  %v216_v30 = vld [vmem:[#allocation5 + $0x378] sm:$0xff]  ;;  %v1430_v32 = vpack.c.bf16 %v207_v26, %v203_v24  ;;  %v209_v34 = vld [vmem:[#allocation5 + $0x340] sm:$0xff] }
  0x94   :  { %1223 = vmatpush1.bf16.msra.mxu0 %v1222_v46  ;;  %v1240_v33 = vpack.c.bf16 %v214_v28, %v210_v27  ;;  %v213_v35 = vld [vmem:[#allocation5 + $0x360] sm:$0xff]  ;;  %v211_v36 = vld [vmem:[#allocation5 + $0x350] sm:$0xff]  ;;  %v1432_v37 = vpack.c.bf16 %v216_v30, %v212_v29  ;;  %v218_v39 = vld [vmem:[#allocation5 + $0x388] sm:$0xff] }
  0x95   :  { %1415 = vmatpush1.bf16.msra.mxu1 %v1414_v47  ;;  %1225 = vmatprep.subr.bf16.mxu0 %v1224_v48  ;;  %v215_v38 = vld [vmem:[#allocation5 + $0x370] sm:$0xff]  ;;  %v222_v40 = vld [vmem:[#allocation5 + $0x3a8] sm:$0xff]  ;;  %v220_v41 = vld [vmem:[#allocation5 + $0x398] sm:$0xff]  ;;  %v1242_v43 = vpack.c.bf16 %v213_v35, %v209_v34 }
  0x96   :  { %1417 = vmatprep.subr.bf16.mxu1 %v1416_v52  ;;  %v224_v42 = vld [vmem:[#allocation5 + $0x3b8] sm:$0xff]  ;;  %v1434_v44 = vpack.c.bf16 %v215_v38, %v211_v36  ;;  %v1244_v45 = vpack.c.bf16 %v222_v40, %v218_v39  ;;  %v217_v46 = vld [vmem:[#allocation5 + $0x380] sm:$0xff]  ;;  %v219_v48 = vld [vmem:[#allocation5 + $0x390] sm:$0xff] }
  0x97   :  { %v221_v47 = vld [vmem:[#allocation5 + $0x3a0] sm:$0xff]  ;;  %v1436_v49 = vpack.c.bf16 %v224_v42, %v220_v41  ;;  %v223_v50 = vld [vmem:[#allocation5 + $0x3b0] sm:$0xff]  ;;  %v226_v51 = vld [vmem:[#allocation5 + $0x3c8] sm:$0xff] }
  0x98   :  { %1227 = vmatpush1.bf16.msra.mxu0 %v1226_v58  ;;  %v230_v52 = vld [vmem:[#allocation5 + $0x3e8] sm:$0xff]  ;;  %v228_v53 = vld [vmem:[#allocation5 + $0x3d8] sm:$0xff]  ;;  %v1246_v55 = vpack.c.bf16 %v221_v47, %v217_v46  ;;  %v1438_v56 = vpack.c.bf16 %v223_v50, %v219_v48  ;;  %v225_v58 = vld [vmem:[#allocation5 + $0x3c0] sm:$0xff] }
  0x99   :  { %1419 = vmatpush1.bf16.msra.mxu1 %v1418_v59  ;;  %1229 = vmatprep.subr.bf16.mxu0 %v1228_v60  ;;  %v232_v54 = vld [vmem:[#allocation5 + $0x3f8] sm:$0xff]  ;;  %v1248_v57 = vpack.c.bf16 %v230_v52, %v226_v51  ;;  %v229_v59 = vld [vmem:[#allocation5 + $0x3e0] sm:$0xff]  ;;  %v227_v60 = vld [vmem:[#allocation5 + $0x3d0] sm:$0xff] }
  0x9a   :  { %1421 = vmatprep.subr.bf16.mxu1 %v1420_v0  ;;  %v1440_v61 = vpack.c.bf16 %v232_v54, %v228_v53  ;;  %v231_v62 = vld [vmem:[#allocation5 + $0x3f0] sm:$0xff]  ;;  %v234_v63 = vld [vmem:[#allocation5 + $0x408] sm:$0xff]  ;;  %v236_v1 = vld [vmem:[#allocation5 + $0x418] sm:$0xff]  ;;  %v1250_v3 = vpack.c.bf16 %v229_v59, %v225_v58 }
  0x9b   :  { %v238_v0 = vld [vmem:[#allocation5 + $0x428] sm:$0xff]  ;;  %v240_v2 = vld [vmem:[#allocation5 + $0x438] sm:$0xff]  ;;  %v1442_v4 = vpack.c.bf16 %v231_v62, %v227_v60  ;;  %v237_v7 = vld [vmem:[#allocation5 + $0x420] sm:$0xff] }
  0x9c   :  { %1231 = vmatpush1.bf16.msra.mxu0 %v1230_v6  ;;  %v1252_v5 = vpack.c.bf16 %v238_v0, %v234_v63  ;;  %v233_v6 = vld [vmem:[#allocation5 + $0x400] sm:$0xff]  ;;  %v239_v10 = vld [vmem:[#allocation5 + $0x430] sm:$0xff]  ;;  %v242_v11 = vld [vmem:[#allocation5 + $0x448] sm:$0xff] }
  0x9d   :  { %1423 = vmatpush1.bf16.msra.mxu1 %v1422_v8  ;;  %1233 = vmatprep.subr.bf16.mxu0 %v1232_v9  ;;  %v235_v8 = vld [vmem:[#allocation5 + $0x410] sm:$0xff]  ;;  %v1444_v9 = vpack.c.bf16 %v240_v2, %v236_v1  ;;  %v246_v12 = vld [vmem:[#allocation5 + $0x468] sm:$0xff]  ;;  %v248_v14 = vld [vmem:[#allocation5 + $0x478] sm:$0xff]  ;;  %v1254_v16 = vpack.c.bf16 %v237_v7, %v233_v6 }
  0x9e   :  { %1425 = vmatprep.subr.bf16.mxu1 %v1424_v13  ;;  %v244_v13 = vld [vmem:[#allocation5 + $0x458] sm:$0xff]  ;;  %v99_v15 = vld [vmem:[#allocation2] sm:$0xff]  ;;  %v1446_v17 = vpack.c.bf16 %v239_v10, %v235_v8  ;;  %v1256_v18 = vpack.c.bf16 %v246_v12, %v242_v11  ;;  %v250_v24 = vld [vmem:[#allocation5 + $0x488] sm:$0xff] }
  0x9f   :  { %v1448_v22 = vpack.c.bf16 %v248_v14, %v244_v13  ;;  %v247_v23 = vld [vmem:[#allocation5 + $0x470] sm:$0xff]  ;;  %v252_v26 = vld [vmem:[#allocation5 + $0x498] sm:$0xff]  ;;  %v258_v36 = vld [vmem:[#allocation5 + $0x4c8] sm:$0xff] }
  0xa0   :  { %1235 = vmatpush1.bf16.msra.mxu0 %v1234_v19  ;;  %v241_v19 = vld [vmem:[#allocation5 + $0x440] sm:$0xff]  ;;  %v256_v27 = vld [vmem:[#allocation5 + $0x4b8] sm:$0xff]  ;;  %v255_v35 = vld [vmem:[#allocation5 + $0x4b0] sm:$0xff] }
  0xa1   :  { %1427 = vmatpush1.bf16.msra.mxu1 %v1426_v20  ;;  %1237 = vmatprep.subr.bf16.mxu0 %v1236_v21  ;;  %v245_v20 = vld [vmem:[#allocation5 + $0x460] sm:$0xff]  ;;  %v243_v21 = vld [vmem:[#allocation5 + $0x450] sm:$0xff]  ;;  %v1452_v34 = vpack.c.bf16 %v256_v27, %v252_v26  ;;  %v260_v38 = vld [vmem:[#allocation5 + $0x4d8] sm:$0xff] }
  0xa2   :  { %1429 = vmatprep.subr.bf16.mxu1 %v1428_v25  ;;  %v254_v25 = vld [vmem:[#allocation5 + $0x4a8] sm:$0xff]  ;;  %v1258_v28 = vpack.c.bf16 %v245_v20, %v241_v19  ;;  %v1450_v29 = vpack.c.bf16 %v247_v23, %v243_v21  ;;  %v264_v39 = vld [vmem:[#allocation5 + $0x4f8] sm:$0xff]  ;;  %v263_v47 = vld [vmem:[#allocation5 + $0x4f0] sm:$0xff] }
  0xa3   :  { %v1260_v30 = vpack.c.bf16 %v254_v25, %v250_v24  ;;  %v1456_v46 = vpack.c.bf16 %v264_v39, %v260_v38  ;;  %v266_v48 = vld [vmem:[#allocation5 + $0x508] sm:$0xff]  ;;  %v268_v50 = vld [vmem:[#allocation5 + $0x518] sm:$0xff]  ;;  %v271_v59 = vld [vmem:[#allocation5 + $0x530] sm:$0xff] }
  0xa4   :  { %1239 = vmatpush1.bf16.msra.mxu0 %v1238_v31  ;;  %v249_v31 = vld [vmem:[#allocation5 + $0x480] sm:$0xff]  ;;  %v272_v51 = vld [vmem:[#allocation5 + $0x538] sm:$0xff]  ;;  %v274_v60 = vld [vmem:[#allocation5 + $0x548] sm:$0xff] }
  0xa5   :  { %1431 = vmatpush1.bf16.msra.mxu1 %v1430_v32  ;;  %1241 = vmatprep.subr.bf16.mxu0 %v1240_v33  ;;  %v253_v32 = vld [vmem:[#allocation5 + $0x4a0] sm:$0xff]  ;;  %v251_v33 = vld [vmem:[#allocation5 + $0x490] sm:$0xff]  ;;  %v1460_v58 = vpack.c.bf16 %v272_v51, %v268_v50  ;;  %v276_v62 = vld [vmem:[#allocation5 + $0x558] sm:$0xff] }
  0xa6   :  { %1433 = vmatprep.subr.bf16.mxu1 %v1432_v37  ;;  %v262_v37 = vld [vmem:[#allocation5 + $0x4e8] sm:$0xff]  ;;  %v1262_v40 = vpack.c.bf16 %v253_v32, %v249_v31  ;;  %v1454_v41 = vpack.c.bf16 %v255_v35, %v251_v33  ;;  %v280_v63 = vld [vmem:[#allocation5 + $0x578] sm:$0xff]  ;;  %v279_v7 = vld [vmem:[#allocation5 + $0x570] sm:$0xff] }
  0xa7   :  { %v1264_v42 = vpack.c.bf16 %v262_v37, %v258_v36  ;;  %v1464_v6 = vpack.c.bf16 %v280_v63, %v276_v62  ;;  %v282_v8 = vld [vmem:[#allocation5 + $0x588] sm:$0xff]  ;;  %v284_v10 = vld [vmem:[#allocation5 + $0x598] sm:$0xff]  ;;  %v281_v13 = vld [vmem:[#allocation5 + $0x580] sm:$0xff] }
  0xa8   :  { %1243 = vmatpush1.bf16.msra.mxu0 %v1242_v43  ;;  %v257_v43 = vld [vmem:[#allocation5 + $0x4c0] sm:$0xff]  ;;  %v288_v11 = vld [vmem:[#allocation5 + $0x5b8] sm:$0xff]  ;;  %v290_v20 = vld [vmem:[#allocation5 + $0x5c8] sm:$0xff] }
  0xa9   :  { %1435 = vmatpush1.bf16.msra.mxu1 %v1434_v44  ;;  %1245 = vmatprep.subr.bf16.mxu0 %v1244_v45  ;;  %v261_v44 = vld [vmem:[#allocation5 + $0x4e0] sm:$0xff]  ;;  %v259_v45 = vld [vmem:[#allocation5 + $0x4d0] sm:$0xff]  ;;  %v1468_v19 = vpack.c.bf16 %v288_v11, %v284_v10  ;;  %v294_v21 = vld [vmem:[#allocation5 + $0x5e8] sm:$0xff] }
  0xaa   :  { %1437 = vmatprep.subr.bf16.mxu1 %v1436_v49  ;;  %v270_v49 = vld [vmem:[#allocation5 + $0x528] sm:$0xff]  ;;  %v1266_v52 = vpack.c.bf16 %v261_v44, %v257_v43  ;;  %v1458_v53 = vpack.c.bf16 %v263_v47, %v259_v45  ;;  %v292_v23 = vld [vmem:[#allocation5 + $0x5d8] sm:$0xff]  ;;  %v1280_v27 = vpack.c.bf16 %v294_v21, %v290_v20  ;;  %v295_v32 = vld [vmem:[#allocation5 + $0x5f0] sm:$0xff] }
  0xab   :  { %v1268_v54 = vpack.c.bf16 %v270_v49, %v266_v48  ;;  %v296_v24 = vld [vmem:[#allocation5 + $0x5f8] sm:$0xff]  ;;  %v298_v33 = vld [vmem:[#allocation5 + $0x608] sm:$0xff]  ;;  %v303_v44 = vld [vmem:[#allocation5 + $0x630] sm:$0xff] }
  0xac   :  { %1247 = vmatpush1.bf16.msra.mxu0 %v1246_v55  ;;  %v265_v55 = vld [vmem:[#allocation5 + $0x500] sm:$0xff]  ;;  %v1472_v31 = vpack.c.bf16 %v296_v24, %v292_v23  ;;  %v300_v35 = vld [vmem:[#allocation5 + $0x618] sm:$0xff]  ;;  %v306_v45 = vld [vmem:[#allocation5 + $0x648] sm:$0xff] }
  0xad   :  { %1439 = vmatpush1.bf16.msra.mxu1 %v1438_v56  ;;  %1249 = vmatprep.subr.bf16.mxu0 %v1248_v57  ;;  %v269_v56 = vld [vmem:[#allocation5 + $0x520] sm:$0xff]  ;;  %v267_v57 = vld [vmem:[#allocation5 + $0x510] sm:$0xff]  ;;  %v304_v36 = vld [vmem:[#allocation5 + $0x638] sm:$0xff] }
  0xae   :  { %1441 = vmatprep.subr.bf16.mxu1 %v1440_v61  ;;  %v278_v61 = vld [vmem:[#allocation5 + $0x568] sm:$0xff]  ;;  %v1270_v0 = vpack.c.bf16 %v269_v56, %v265_v55  ;;  %v1462_v1 = vpack.c.bf16 %v271_v59, %v267_v57  ;;  %v1476_v43 = vpack.c.bf16 %v304_v36, %v300_v35  ;;  %v308_v47 = vld [vmem:[#allocation5 + $0x658] sm:$0xff]  ;;  %v311_v56 = vld [vmem:[#allocation5 + $0x670] sm:$0xff] }
  0xaf   :  { %v1272_v2 = vpack.c.bf16 %v278_v61, %v274_v60  ;;  %v312_v48 = vld [vmem:[#allocation5 + $0x678] sm:$0xff]  ;;  %v314_v57 = vld [vmem:[#allocation5 + $0x688] sm:$0xff]  ;;  %v329_v24 = vld [vmem:[#allocation5 + $0x700] sm:$0xff] }
  0xb0   :  { %1251 = vmatpush1.bf16.msra.mxu0 %v1250_v3  ;;  %v273_v3 = vld [vmem:[#allocation5 + $0x540] sm:$0xff]  ;;  %v1480_v55 = vpack.c.bf16 %v312_v48, %v308_v47  ;;  %v316_v59 = vld [vmem:[#allocation5 + $0x698] sm:$0xff] }
  0xb1   :  { %1443 = vmatpush1.bf16.msra.mxu1 %v1442_v4  ;;  %1253 = vmatprep.subr.bf16.mxu0 %v1252_v5  ;;  %v277_v4 = vld [vmem:[#allocation5 + $0x560] sm:$0xff]  ;;  %v275_v5 = vld [vmem:[#allocation5 + $0x550] sm:$0xff]  ;;  %v320_v60 = vld [vmem:[#allocation5 + $0x6b8] sm:$0xff] }
  0xb2   :  { %1445 = vmatprep.subr.bf16.mxu1 %v1444_v9  ;;  %v286_v9 = vld [vmem:[#allocation5 + $0x5a8] sm:$0xff]  ;;  %v1274_v12 = vpack.c.bf16 %v277_v4, %v273_v3  ;;  %v1466_v14 = vpack.c.bf16 %v279_v7, %v275_v5  ;;  %v1484_v3 = vpack.c.bf16 %v320_v60, %v316_v59  ;;  %v319_v4 = vld [vmem:[#allocation5 + $0x6b0] sm:$0xff]  ;;  %v324_v7 = vld [vmem:[#allocation5 + $0x6d8] sm:$0xff] }
  0xb3   :  { %576 = vmatmul.mubr.f32.vlgmr.msra.gmra.mrb[0].mxu0 %v99_v15  ;;  %v322_v5 = vld [vmem:[#allocation5 + $0x6c8] sm:$0xff]  ;;  %v336_v20 = vld [vmem:[#allocation5 + $0x738] sm:$0xff]  ;;  %v337_v36 = vld [vmem:[#allocation5 + $0x740] sm:$0xff] }
  0xb4   :  { %1255 = vmatpush1.bf16.msra.mxu0 %v1254_v16  ;;  %789 = vmatmul.mubr.f32.vlgmr.msra.gmra.mrb[0].mxu1 %v99_v15  ;;  %v1276_v15 = vpack.c.bf16 %v286_v9, %v282_v8  ;;  %v285_v16 = vld [vmem:[#allocation5 + $0x5a0] sm:$0xff]  ;;  %v328_v8 = vld [vmem:[#allocation5 + $0x6f8] sm:$0xff] }
  0xb5   :  { %1447 = vmatpush1.bf16.msra.mxu1 %v1446_v17  ;;  %1257 = vmatprep.subr.bf16.mxu0 %v1256_v18  ;;  %v283_v17 = vld [vmem:[#allocation5 + $0x590] sm:$0xff]  ;;  %v1278_v25 = vpack.c.bf16 %v285_v16, %v281_v13  ;;  %v325_v13 = vld [vmem:[#allocation5 + $0x6e0] sm:$0xff] }
  0xb6   :  { %1449 = vmatprep.subr.bf16.mxu1 %v1448_v22  ;;  %v287_v18 = vld [vmem:[#allocation5 + $0x5b0] sm:$0xff]  ;;  %v102_v22 = vld [vmem:[#allocation2 + $0x18] sm:$0xff]  ;;  %v345_v48 = vld [vmem:[#allocation5 + $0x780] sm:$0xff] }
  0xb7   :  { %646 = vmatprep.mubr.f32.mxu0 %v102_v22  ;;  %859 = vmatprep.mubr.f32.mxu1 %v102_v22  ;;  %v1470_v26 = vpack.c.bf16 %v287_v18, %v283_v17  ;;  %v327_v16 = vld [vmem:[#allocation5 + $0x6f0] sm:$0xff]  ;;  %v330_v17 = vld [vmem:[#allocation5 + $0x708] sm:$0xff]  ;;  %v353_v60 = vld [vmem:[#allocation5 + $0x7c0] sm:$0xff] }
  0xb8   :  { %1259 = vmatpush1.bf16.msra.mxu0 %v1258_v28  ;;  %v289_v28 = vld [vmem:[#allocation5 + $0x5c0] sm:$0xff]  ;;  %v334_v18 = vld [vmem:[#allocation5 + $0x728] sm:$0xff] }
  0xb9   :  { %1451 = vmatpush1.bf16.msra.mxu1 %v1450_v29  ;;  %1261 = vmatprep.subr.bf16.mxu0 %v1260_v30  ;;  %v293_v29 = vld [vmem:[#allocation5 + $0x5e0] sm:$0xff]  ;;  %v291_v30 = vld [vmem:[#allocation5 + $0x5d0] sm:$0xff]  ;;  %v1300_v23 = vpack.c.bf16 %v334_v18, %v330_v17 }
  0xba   :  { %1453 = vmatprep.subr.bf16.mxu1 %v1452_v34  ;;  %v302_v34 = vld [vmem:[#allocation5 + $0x628] sm:$0xff]  ;;  %v1282_v37 = vpack.c.bf16 %v293_v29, %v289_v28  ;;  %v1474_v38 = vpack.c.bf16 %v295_v32, %v291_v30  ;;  %v335_v28 = vld [vmem:[#allocation5 + $0x730] sm:$0xff]  ;;  %v344_v32 = vld [vmem:[#allocation5 + $0x778] sm:$0xff] }
  0xbb   :  { %v1284_v39 = vpack.c.bf16 %v302_v34, %v298_v33  ;;  %v338_v29 = vld [vmem:[#allocation5 + $0x748] sm:$0xff]  ;;  %v101_v17 = vld [vmem:[#allocation2 + $0x10] sm:$0xff] }
  0xbc   :  { %1263 = vmatpush1.bf16.msra.mxu0 %v1262_v40  ;;  %v297_v40 = vld [vmem:[#allocation5 + $0x600] sm:$0xff]  ;;  %v342_v30 = vld [vmem:[#allocation5 + $0x768] sm:$0xff] }
  0xbd   :  { %1455 = vmatpush1.bf16.msra.mxu1 %v1454_v41  ;;  %1265 = vmatprep.subr.bf16.mxu0 %v1264_v42  ;;  %v301_v41 = vld [vmem:[#allocation5 + $0x620] sm:$0xff]  ;;  %v299_v42 = vld [vmem:[#allocation5 + $0x610] sm:$0xff]  ;;  %v1304_v35 = vpack.c.bf16 %v342_v30, %v338_v29  ;;  %v384_v29 = vld [vmem:[#allocation5 + $0x8b8] sm:$0xff] }
  0xbe   :  { %1457 = vmatprep.subr.bf16.mxu1 %v1456_v46  ;;  %v310_v46 = vld [vmem:[#allocation5 + $0x668] sm:$0xff]  ;;  %v1286_v49 = vpack.c.bf16 %v301_v41, %v297_v40  ;;  %v1478_v50 = vpack.c.bf16 %v303_v44, %v299_v42  ;;  %v343_v40 = vld [vmem:[#allocation5 + $0x770] sm:$0xff]  ;;  %v352_v44 = vld [vmem:[#allocation5 + $0x7b8] sm:$0xff] }
  0xbf   :  { %v1288_v51 = vpack.c.bf16 %v310_v46, %v306_v45  ;;  %v346_v41 = vld [vmem:[#allocation5 + $0x788] sm:$0xff]  ;;  %v104_v30 = vld [vmem:[#allocation2 + $0x28] sm:$0xff] }
  0xc0   :  { %1267 = vmatpush1.bf16.msra.mxu0 %v1266_v52  ;;  %v305_v52 = vld [vmem:[#allocation5 + $0x640] sm:$0xff]  ;;  %v350_v42 = vld [vmem:[#allocation5 + $0x7a8] sm:$0xff] }
  0xc1   :  { %1459 = vmatpush1.bf16.msra.mxu1 %v1458_v53  ;;  %1269 = vmatprep.subr.bf16.mxu0 %v1268_v54  ;;  %v309_v53 = vld [vmem:[#allocation5 + $0x660] sm:$0xff]  ;;  %v307_v54 = vld [vmem:[#allocation5 + $0x650] sm:$0xff]  ;;  %v1308_v47 = vpack.c.bf16 %v350_v42, %v346_v41  ;;  %v388_v41 = vld [vmem:[#allocation5 + $0x8d8] sm:$0xff] }
  0xc2   :  { %1461 = vmatprep.subr.bf16.mxu1 %v1460_v58  ;;  %v318_v58 = vld [vmem:[#allocation5 + $0x6a8] sm:$0xff]  ;;  %v1290_v61 = vpack.c.bf16 %v309_v53, %v305_v52  ;;  %v1482_v62 = vpack.c.bf16 %v311_v56, %v307_v54  ;;  %v351_v52 = vld [vmem:[#allocation5 + $0x7b0] sm:$0xff]  ;;  %v360_v56 = vld [vmem:[#allocation5 + $0x7f8] sm:$0xff] }
  0xc3   :  { %v1292_v63 = vpack.c.bf16 %v318_v58, %v314_v57  ;;  %v354_v53 = vld [vmem:[#allocation5 + $0x7c8] sm:$0xff]  ;;  %v392_v42 = vld [vmem:[#allocation5 + $0x8f8] sm:$0xff] }
  0xc4   :  { %1271 = vmatpush1.bf16.msra.mxu0 %v1270_v0  ;;  %v313_v0 = vld [vmem:[#allocation5 + $0x680] sm:$0xff]  ;;  %v358_v54 = vld [vmem:[#allocation5 + $0x7e8] sm:$0xff] }
  0xc5   :  { %1463 = vmatpush1.bf16.msra.mxu1 %v1462_v1  ;;  %1273 = vmatprep.subr.bf16.mxu0 %v1272_v2  ;;  %v317_v1 = vld [vmem:[#allocation5 + $0x6a0] sm:$0xff]  ;;  %v315_v2 = vld [vmem:[#allocation5 + $0x690] sm:$0xff]  ;;  %v1312_v59 = vpack.c.bf16 %v358_v54, %v354_v53  ;;  %v396_v53 = vld [vmem:[#allocation5 + $0x918] sm:$0xff] }
  0xc6   :  { %1465 = vmatprep.subr.bf16.mxu1 %v1464_v6  ;;  %v326_v6 = vld [vmem:[#allocation5 + $0x6e8] sm:$0xff]  ;;  %v1294_v9 = vpack.c.bf16 %v317_v1, %v313_v0  ;;  %v1486_v10 = vpack.c.bf16 %v319_v4, %v315_v2  ;;  %v359_v0 = vld [vmem:[#allocation5 + $0x7f0] sm:$0xff]  ;;  %v368_v4 = vld [vmem:[#allocation5 + $0x838] sm:$0xff] }
  0xc7   :  { %v1296_v11 = vpack.c.bf16 %v326_v6, %v322_v5  ;;  %v362_v1 = vld [vmem:[#allocation5 + $0x808] sm:$0xff]  ;;  %v400_v54 = vld [vmem:[#allocation5 + $0x938] sm:$0xff] }
  0xc8   :  { %1275 = vmatpush1.bf16.msra.mxu0 %v1274_v12  ;;  %v321_v12 = vld [vmem:[#allocation5 + $0x6c0] sm:$0xff]  ;;  %v366_v2 = vld [vmem:[#allocation5 + $0x828] sm:$0xff] }
  0xc9   :  { %1467 = vmatpush1.bf16.msra.mxu1 %v1466_v14  ;;  %1277 = vmatprep.subr.bf16.mxu0 %v1276_v15  ;;  %v323_v14 = vld [vmem:[#allocation5 + $0x6d0] sm:$0xff]  ;;  %v1488_v15 = vpack.c.bf16 %v328_v8, %v324_v7  ;;  %v1298_v21 = vpack.c.bf16 %v325_v13, %v321_v12  ;;  %v1316_v7 = vpack.c.bf16 %v366_v2, %v362_v1  ;;  %v361_v8 = vld [vmem:[#allocation5 + $0x800] sm:$0xff]  ;;  %v370_v13 = vld [vmem:[#allocation5 + $0x848] sm:$0xff] }
  0xca   :  { %1469 = vmatprep.subr.bf16.mxu1 %v1468_v19  ;;  %v332_v19 = vld [vmem:[#allocation5 + $0x718] sm:$0xff]  ;;  %v1490_v22 = vpack.c.bf16 %v327_v16, %v323_v14  ;;  %v367_v12 = vld [vmem:[#allocation5 + $0x830] sm:$0xff]  ;;  %v374_v14 = vld [vmem:[#allocation5 + $0x868] sm:$0xff] }
  0xcb   :  { %v376_v16 = vld [vmem:[#allocation5 + $0x878] sm:$0xff] }
  0xcc   :  { %1279 = vmatpush1.bf16.msra.mxu0 %v1278_v25  ;;  %v333_v25 = vld [vmem:[#allocation5 + $0x720] sm:$0xff]  ;;  %v404_v1 = vld [vmem:[#allocation5 + $0x958] sm:$0xff] }
  0xcd   :  { %1471 = vmatpush1.bf16.msra.mxu1 %v1470_v26  ;;  %1281 = vmatprep.subr.bf16.mxu0 %v1280_v27  ;;  %v331_v26 = vld [vmem:[#allocation5 + $0x710] sm:$0xff]  ;;  %v1492_v27 = vpack.c.bf16 %v336_v20, %v332_v19  ;;  %v1302_v33 = vpack.c.bf16 %v333_v25, %v329_v24  ;;  %v1320_v20 = vpack.c.bf16 %v374_v14, %v370_v13  ;;  %v408_v2 = vld [vmem:[#allocation5 + $0x978] sm:$0xff] }
  0xce   :  { %1473 = vmatprep.subr.bf16.mxu1 %v1472_v31  ;;  %v340_v31 = vld [vmem:[#allocation5 + $0x758] sm:$0xff]  ;;  %v1494_v34 = vpack.c.bf16 %v335_v28, %v331_v26  ;;  %v375_v25 = vld [vmem:[#allocation5 + $0x870] sm:$0xff]  ;;  %v378_v26 = vld [vmem:[#allocation5 + $0x888] sm:$0xff] }
  0xcf   :  { %v380_v28 = vld [vmem:[#allocation5 + $0x898] sm:$0xff] }
  0xd0   :  { %1283 = vmatpush1.bf16.msra.mxu0 %v1282_v37  ;;  %v341_v37 = vld [vmem:[#allocation5 + $0x760] sm:$0xff]  ;;  %v412_v13 = vld [vmem:[#allocation5 + $0x998] sm:$0xff] }
  0xd1   :  { %1475 = vmatpush1.bf16.msra.mxu1 %v1474_v38  ;;  %1285 = vmatprep.subr.bf16.mxu0 %v1284_v39  ;;  %v339_v38 = vld [vmem:[#allocation5 + $0x750] sm:$0xff]  ;;  %v1496_v39 = vpack.c.bf16 %v344_v32, %v340_v31  ;;  %v1306_v45 = vpack.c.bf16 %v341_v37, %v337_v36  ;;  %v1516_v37 = vpack.c.bf16 %v384_v29, %v380_v28  ;;  %v416_v14 = vld [vmem:[#allocation5 + $0x9b8] sm:$0xff] }
  0xd2   :  { %1477 = vmatprep.subr.bf16.mxu1 %v1476_v43  ;;  %v348_v43 = vld [vmem:[#allocation5 + $0x798] sm:$0xff]  ;;  %v1498_v46 = vpack.c.bf16 %v343_v40, %v339_v38  ;;  %v379_v36 = vld [vmem:[#allocation5 + $0x890] sm:$0xff]  ;;  %v390_v40 = vld [vmem:[#allocation5 + $0x8e8] sm:$0xff] }
  0xd3   :  { %v383_v38 = vld [vmem:[#allocation5 + $0x8b0] sm:$0xff] }
  0xd4   :  { %1287 = vmatpush1.bf16.msra.mxu0 %v1286_v49  ;;  %v349_v49 = vld [vmem:[#allocation5 + $0x7a0] sm:$0xff] }
  0xd5   :  { %1479 = vmatpush1.bf16.msra.mxu1 %v1478_v50  ;;  %1289 = vmatprep.subr.bf16.mxu0 %v1288_v51  ;;  %v347_v50 = vld [vmem:[#allocation5 + $0x790] sm:$0xff]  ;;  %v1500_v51 = vpack.c.bf16 %v352_v44, %v348_v43  ;;  %v1310_v57 = vpack.c.bf16 %v349_v49, %v345_v48  ;;  %v1518_v44 = vpack.c.bf16 %v383_v38, %v379_v36  ;;  %v430_v36 = vld [vmem:[#allocation5 + $0xa28] sm:$0xff]  ;;  %v432_v38 = vld [vmem:[#allocation5 + $0xa38] sm:$0xff] }
  0xd6   :  { %1481 = vmatprep.subr.bf16.mxu1 %v1480_v55  ;;  %v356_v55 = vld [vmem:[#allocation5 + $0x7d8] sm:$0xff]  ;;  %v1502_v58 = vpack.c.bf16 %v351_v52, %v347_v50  ;;  %v387_v48 = vld [vmem:[#allocation5 + $0x8d0] sm:$0xff]  ;;  %v1520_v49 = vpack.c.bf16 %v392_v42, %v388_v41  ;;  %v398_v52 = vld [vmem:[#allocation5 + $0x928] sm:$0xff] }
  0xd7   :  { %v391_v50 = vld [vmem:[#allocation5 + $0x8f0] sm:$0xff]  ;;  %v425_v42 = vld [vmem:[#allocation5 + $0xa00] sm:$0xff] }
  0xd8   :  { %1291 = vmatpush1.bf16.msra.mxu0 %v1290_v61  ;;  %v357_v61 = vld [vmem:[#allocation5 + $0x7e0] sm:$0xff] }
  0xd9   :  { %1483 = vmatpush1.bf16.msra.mxu1 %v1482_v62  ;;  %1293 = vmatprep.subr.bf16.mxu0 %v1292_v63  ;;  %v355_v62 = vld [vmem:[#allocation5 + $0x7d0] sm:$0xff]  ;;  %v1504_v63 = vpack.c.bf16 %v360_v56, %v356_v55  ;;  %v1314_v5 = vpack.c.bf16 %v357_v61, %v353_v60  ;;  %v1522_v56 = vpack.c.bf16 %v391_v50, %v387_v48  ;;  %v438_v48 = vld [vmem:[#allocation5 + $0xa68] sm:$0xff]  ;;  %v440_v50 = vld [vmem:[#allocation5 + $0xa78] sm:$0xff] }
  0xda   :  { %1485 = vmatprep.subr.bf16.mxu1 %v1484_v3  ;;  %v364_v3 = vld [vmem:[#allocation5 + $0x818] sm:$0xff]  ;;  %v1506_v6 = vpack.c.bf16 %v359_v0, %v355_v62  ;;  %v395_v60 = vld [vmem:[#allocation5 + $0x910] sm:$0xff]  ;;  %v1524_v61 = vpack.c.bf16 %v400_v54, %v396_v53  ;;  %v406_v0 = vld [vmem:[#allocation5 + $0x968] sm:$0xff] }
  0xdb   :  { %v399_v62 = vld [vmem:[#allocation5 + $0x930] sm:$0xff]  ;;  %v433_v54 = vld [vmem:[#allocation5 + $0xa40] sm:$0xff] }
  0xdc   :  { %1295 = vmatpush1.bf16.msra.mxu0 %v1294_v9  ;;  %v365_v9 = vld [vmem:[#allocation5 + $0x820] sm:$0xff] }
  0xdd   :  { %1487 = vmatpush1.bf16.msra.mxu1 %v1486_v10  ;;  %1297 = vmatprep.subr.bf16.mxu0 %v1296_v11  ;;  %v363_v10 = vld [vmem:[#allocation5 + $0x810] sm:$0xff]  ;;  %v1508_v11 = vpack.c.bf16 %v368_v4, %v364_v3  ;;  %v1318_v18 = vpack.c.bf16 %v365_v9, %v361_v8  ;;  %v1526_v4 = vpack.c.bf16 %v399_v62, %v395_v60  ;;  %v446_v60 = vld [vmem:[#allocation5 + $0xaa8] sm:$0xff]  ;;  %v448_v62 = vld [vmem:[#allocation5 + $0xab8] sm:$0xff] }
  0xde   :  { %1489 = vmatprep.subr.bf16.mxu1 %v1488_v15  ;;  %v372_v15 = vld [vmem:[#allocation5 + $0x858] sm:$0xff]  ;;  %v1510_v19 = vpack.c.bf16 %v367_v12, %v363_v10  ;;  %v403_v8 = vld [vmem:[#allocation5 + $0x950] sm:$0xff]  ;;  %v1528_v9 = vpack.c.bf16 %v408_v2, %v404_v1  ;;  %v414_v12 = vld [vmem:[#allocation5 + $0x9a8] sm:$0xff] }
  0xdf   :  { %v1512_v24 = vpack.c.bf16 %v376_v16, %v372_v15  ;;  %v407_v10 = vld [vmem:[#allocation5 + $0x970] sm:$0xff]  ;;  %v441_v2 = vld [vmem:[#allocation5 + $0xa80] sm:$0xff] }
  0xe0   :  { %1299 = vmatpush1.bf16.msra.mxu0 %v1298_v21  ;;  %v369_v21 = vld [vmem:[#allocation5 + $0x840] sm:$0xff]  ;;  %v1530_v16 = vpack.c.bf16 %v407_v10, %v403_v8  ;;  %v454_v8 = vld [vmem:[#allocation5 + $0xae8] sm:$0xff]  ;;  %v456_v10 = vld [vmem:[#allocation5 + $0xaf8] sm:$0xff] }
  0xe1   :  { %1491 = vmatpush1.bf16.msra.mxu1 %v1490_v22  ;;  %1301 = vmatprep.subr.bf16.mxu0 %v1300_v23  ;;  %v373_v22 = vld [vmem:[#allocation5 + $0x860] sm:$0xff]  ;;  %v371_v23 = vld [vmem:[#allocation5 + $0x850] sm:$0xff] }
  0xe2   :  { %1493 = vmatprep.subr.bf16.mxu1 %v1492_v27  ;;  %v382_v27 = vld [vmem:[#allocation5 + $0x8a8] sm:$0xff]  ;;  %v1322_v31 = vpack.c.bf16 %v373_v22, %v369_v21  ;;  %v1514_v32 = vpack.c.bf16 %v375_v25, %v371_v23  ;;  %v1532_v21 = vpack.c.bf16 %v416_v14, %v412_v13  ;;  %v415_v22 = vld [vmem:[#allocation5 + $0x9b0] sm:$0xff]  ;;  %v420_v25 = vld [vmem:[#allocation5 + $0x9d8] sm:$0xff] }
  0xe3   :  { %v418_v23 = vld [vmem:[#allocation5 + $0x9c8] sm:$0xff]  ;;  %v449_v14 = vld [vmem:[#allocation5 + $0xac0] sm:$0xff] }
  0xe4   :  { %1303 = vmatpush1.bf16.msra.mxu0 %v1302_v33  ;;  %v1324_v33 = vpack.c.bf16 %v382_v27, %v378_v26  ;;  %v424_v26 = vld [vmem:[#allocation5 + $0x9f8] sm:$0xff] }
  0xe5   :  { %1495 = vmatpush1.bf16.msra.mxu1 %v1494_v34  ;;  %1305 = vmatprep.subr.bf16.mxu0 %v1304_v35  ;;  %v377_v34 = vld [vmem:[#allocation5 + $0x880] sm:$0xff] }
  0xe6   :  { %1497 = vmatprep.subr.bf16.mxu1 %v1496_v39  ;;  %v381_v35 = vld [vmem:[#allocation5 + $0x8a0] sm:$0xff]  ;;  %v386_v39 = vld [vmem:[#allocation5 + $0x8c8] sm:$0xff] }
  0xe7   :  { %v1326_v43 = vpack.c.bf16 %v381_v35, %v377_v34  ;;  %v423_v34 = vld [vmem:[#allocation5 + $0x9f0] sm:$0xff]  ;;  %v426_v35 = vld [vmem:[#allocation5 + $0xa08] sm:$0xff] }
  0xe8   :  { %1307 = vmatpush1.bf16.msra.mxu0 %v1306_v45  ;;  %v1328_v45 = vpack.c.bf16 %v390_v40, %v386_v39  ;;  %v1348_v41 = vpack.c.bf16 %v430_v36, %v426_v35 }
  0xe9   :  { %1499 = vmatpush1.bf16.msra.mxu1 %v1498_v46  ;;  %1309 = vmatprep.subr.bf16.mxu0 %v1308_v47  ;;  %v385_v46 = vld [vmem:[#allocation5 + $0x8c0] sm:$0xff] }
  0xea   :  { %1501 = vmatprep.subr.bf16.mxu1 %v1500_v51  ;;  %v389_v47 = vld [vmem:[#allocation5 + $0x8e0] sm:$0xff]  ;;  %v394_v51 = vld [vmem:[#allocation5 + $0x908] sm:$0xff] }
  0xeb   :  { %v1330_v55 = vpack.c.bf16 %v389_v47, %v385_v46  ;;  %v431_v46 = vld [vmem:[#allocation5 + $0xa30] sm:$0xff]  ;;  %v434_v47 = vld [vmem:[#allocation5 + $0xa48] sm:$0xff] }
  0xec   :  { %1311 = vmatpush1.bf16.msra.mxu0 %v1310_v57  ;;  %v1332_v57 = vpack.c.bf16 %v398_v52, %v394_v51  ;;  %v1352_v53 = vpack.c.bf16 %v438_v48, %v434_v47 }
  0xed   :  { %1503 = vmatpush1.bf16.msra.mxu1 %v1502_v58  ;;  %1313 = vmatprep.subr.bf16.mxu0 %v1312_v59  ;;  %v393_v58 = vld [vmem:[#allocation5 + $0x900] sm:$0xff] }
  0xee   :  { %1505 = vmatprep.subr.bf16.mxu1 %v1504_v63  ;;  %v397_v59 = vld [vmem:[#allocation5 + $0x920] sm:$0xff]  ;;  %v402_v63 = vld [vmem:[#allocation5 + $0x948] sm:$0xff] }
  0xef   :  { %v1334_v3 = vpack.c.bf16 %v397_v59, %v393_v58  ;;  %v439_v58 = vld [vmem:[#allocation5 + $0xa70] sm:$0xff]  ;;  %v442_v59 = vld [vmem:[#allocation5 + $0xa88] sm:$0xff] }
  0xf0   :  { %1315 = vmatpush1.bf16.msra.mxu0 %v1314_v5  ;;  %v1336_v5 = vpack.c.bf16 %v406_v0, %v402_v63  ;;  %v1356_v1 = vpack.c.bf16 %v446_v60, %v442_v59 }
  0xf1   :  { %1507 = vmatpush1.bf16.msra.mxu1 %v1506_v6  ;;  %1317 = vmatprep.subr.bf16.mxu0 %v1316_v7  ;;  %v401_v6 = vld [vmem:[#allocation5 + $0x940] sm:$0xff] }
  0xf2   :  { %1509 = vmatprep.subr.bf16.mxu1 %v1508_v11  ;;  %v405_v7 = vld [vmem:[#allocation5 + $0x960] sm:$0xff]  ;;  %v410_v11 = vld [vmem:[#allocation5 + $0x988] sm:$0xff] }
  0xf3   :  { %647 = vmatmul.mubr.f32.vlgmr.msra.gmra.mrb[0].mxu0 %v101_v17  ;;  %v1338_v15 = vpack.c.bf16 %v405_v7, %v401_v6  ;;  %v447_v6 = vld [vmem:[#allocation5 + $0xab0] sm:$0xff]  ;;  %v450_v7 = vld [vmem:[#allocation5 + $0xac8] sm:$0xff] }
  0xf4   :  { %1319 = vmatpush1.bf16.msra.mxu0 %v1318_v18  ;;  %860 = vmatmul.mubr.f32.vlgmr.msra.gmra.mrb[0].mxu1 %v101_v17  ;;  %v1340_v17 = vpack.c.bf16 %v414_v12, %v410_v11  ;;  %v409_v18 = vld [vmem:[#allocation5 + $0x980] sm:$0xff]  ;;  %v1360_v13 = vpack.c.bf16 %v454_v8, %v450_v7  ;;  %v1022_v7 = vld [vmem:[%s2018_s5 + $0x8] sm:$0xff] }
  0xf5   :  { %1511 = vmatpush1.bf16.msra.mxu1 %v1510_v19  ;;  %1321 = vmatprep.subr.bf16.mxu0 %v1320_v20  ;;  %v413_v19 = vld [vmem:[#allocation5 + $0x9a0] sm:$0xff]  ;;  %v411_v20 = vld [vmem:[#allocation5 + $0x990] sm:$0xff] }
  0xf6   :  { %1513 = vmatprep.subr.bf16.mxu1 %v1512_v24  ;;  %717 = vmatprep.mubr.f32.mxu0 %v104_v30  ;;  %v422_v24 = vld [vmem:[#allocation5 + $0x9e8] sm:$0xff]  ;;  %v1342_v27 = vpack.c.bf16 %v413_v19, %v409_v18  ;;  %v1534_v28 = vpack.c.bf16 %v415_v22, %v411_v20  ;;  %v455_v18 = vld [vmem:[#allocation5 + $0xaf0] sm:$0xff]  ;;  %v464_v22 = vld [vmem:[#allocation5 + $0xb38] sm:$0xff] }
  0xf7   :  { %930 = vmatprep.mubr.f32.mxu1 %v104_v30  ;;  %v1344_v29 = vpack.c.bf16 %v422_v24, %v418_v23  ;;  %v417_v30 = vld [vmem:[#allocation5 + $0x9c0] sm:$0xff]  ;;  %v458_v19 = vld [vmem:[#allocation5 + $0xb08] sm:$0xff] }
  0xf8   :  { %1323 = vmatpush1.bf16.msra.mxu0 %v1322_v31  ;;  %v421_v31 = vld [vmem:[#allocation5 + $0x9e0] sm:$0xff]  ;;  %v462_v20 = vld [vmem:[#allocation5 + $0xb28] sm:$0xff] }
  0xf9   :  { %1515 = vmatpush1.bf16.msra.mxu1 %v1514_v32  ;;  %1325 = vmatprep.subr.bf16.mxu0 %v1324_v33  ;;  %v419_v32 = vld [vmem:[#allocation5 + $0x9d0] sm:$0xff]  ;;  %v1536_v33 = vpack.c.bf16 %v424_v26, %v420_v25  ;;  %v1346_v39 = vpack.c.bf16 %v421_v31, %v417_v30  ;;  %v1364_v25 = vpack.c.bf16 %v462_v20, %v458_v19  ;;  %v457_v26 = vld [vmem:[#allocation5 + $0xb00] sm:$0xff]  ;;  %v466_v31 = vld [vmem:[#allocation5 + $0xb48] sm:$0xff] }
  0xfa   :  { %1517 = vmatprep.subr.bf16.mxu1 %v1516_v37  ;;  %v428_v37 = vld [vmem:[#allocation5 + $0xa18] sm:$0xff]  ;;  %v1538_v40 = vpack.c.bf16 %v423_v34, %v419_v32  ;;  %v463_v30 = vld [vmem:[#allocation5 + $0xb30] sm:$0xff]  ;;  %v470_v32 = vld [vmem:[#allocation5 + $0xb68] sm:$0xff] }
  0xfb   :  { %v472_v34 = vld [vmem:[#allocation5 + $0xb78] sm:$0xff]  ;;  %v1029_v19 = vld [vmem:[%s2018_s5 + $0x40] sm:$0xff] }
  0xfc   :  { %1327 = vmatpush1.bf16.msra.mxu0 %v1326_v43  ;;  %v429_v43 = vld [vmem:[#allocation5 + $0xa20] sm:$0xff]  ;;  %v1030_v20 = vld [vmem:[%s2018_s5 + $0x48] sm:$0xff] }
  0xfd   :  { %1519 = vmatpush1.bf16.msra.mxu1 %v1518_v44  ;;  %1329 = vmatprep.subr.bf16.mxu0 %v1328_v45  ;;  %v427_v44 = vld [vmem:[#allocation5 + $0xa10] sm:$0xff]  ;;  %v1540_v45 = vpack.c.bf16 %v432_v38, %v428_v37  ;;  %v1350_v51 = vpack.c.bf16 %v429_v43, %v425_v42  ;;  %v1368_v37 = vpack.c.bf16 %v470_v32, %v466_v31  ;;  %v465_v38 = vld [vmem:[#allocation5 + $0xb40] sm:$0xff]  ;;  %v474_v43 = vld [vmem:[#allocation5 + $0xb88] sm:$0xff]  ;;  %v491_v32 = vlaneseq }
  0xfe   :  { %1521 = vmatprep.subr.bf16.mxu1 %v1520_v49  ;;  %v436_v49 = vld [vmem:[#allocation5 + $0xa58] sm:$0xff]  ;;  %v1542_v52 = vpack.c.bf16 %v431_v46, %v427_v44  ;;  %v471_v42 = vld [vmem:[#allocation5 + $0xb70] sm:$0xff]  ;;  %v478_v44 = vld [vmem:[#allocation5 + $0xba8] sm:$0xff] }
  0xff   :  { %v480_v46 = vld [vmem:[#allocation5 + $0xbb8] sm:$0xff] }
 0x100   :  { %1331 = vmatpush1.bf16.msra.mxu0 %v1330_v55  ;;  %v437_v55 = vld [vmem:[#allocation5 + $0xa60] sm:$0xff] }
 0x101   :  { %1523 = vmatpush1.bf16.msra.mxu1 %v1522_v56  ;;  %1333 = vmatprep.subr.bf16.mxu0 %v1332_v57  ;;  %v435_v56 = vld [vmem:[#allocation5 + $0xa50] sm:$0xff]  ;;  %v1544_v57 = vpack.c.bf16 %v440_v50, %v436_v49  ;;  %v1354_v63 = vpack.c.bf16 %v437_v55, %v433_v54  ;;  %v1372_v49 = vpack.c.bf16 %v478_v44, %v474_v43  ;;  %v473_v50 = vld [vmem:[#allocation5 + $0xb80] sm:$0xff]  ;;  %v482_v55 = vld [vmem:[#allocation5 + $0xbc8] sm:$0xff] }
 0x102   :  { %1525 = vmatprep.subr.bf16.mxu1 %v1524_v61  ;;  %v444_v61 = vld [vmem:[#allocation5 + $0xa98] sm:$0xff]  ;;  %v1546_v0 = vpack.c.bf16 %v439_v58, %v435_v56  ;;  %v479_v54 = vld [vmem:[#allocation5 + $0xbb0] sm:$0xff]  ;;  %v486_v56 = vld [vmem:[#allocation5 + $0xbe8] sm:$0xff] }
 0x103   :  { %v488_v58 = vld [vmem:[#allocation5 + $0xbf8] sm:$0xff] }
 0x104   :  { %1335 = vmatpush1.bf16.msra.mxu0 %v1334_v3  ;;  %v445_v3 = vld [vmem:[#allocation5 + $0xaa0] sm:$0xff] }
 0x105   :  { %1527 = vmatpush1.bf16.msra.mxu1 %v1526_v4  ;;  %1337 = vmatprep.subr.bf16.mxu0 %v1336_v5  ;;  %v443_v4 = vld [vmem:[#allocation5 + $0xa90] sm:$0xff]  ;;  %v1548_v5 = vpack.c.bf16 %v448_v62, %v444_v61  ;;  %v1358_v11 = vpack.c.bf16 %v445_v3, %v441_v2  ;;  %v1376_v61 = vpack.c.bf16 %v486_v56, %v482_v55  ;;  %v481_v62 = vld [vmem:[#allocation5 + $0xbc0] sm:$0xff] }
 0x106   :  { %1529 = vmatprep.subr.bf16.mxu1 %v1528_v9  ;;  %v452_v9 = vld [vmem:[#allocation5 + $0xad8] sm:$0xff]  ;;  %v1550_v12 = vpack.c.bf16 %v447_v6, %v443_v4  ;;  %v487_v2 = vld [vmem:[#allocation5 + $0xbf0] sm:$0xff] }
 0x107   :  { %v1021_v6 = vld [vmem:[%s2018_s5] sm:$0xff] }
 0x108   :  { %1339 = vmatpush1.bf16.msra.mxu0 %v1338_v15  ;;  %v453_v15 = vld [vmem:[#allocation5 + $0xae0] sm:$0xff]  ;;  %v1573_v8 = vpack.c.bf16 %v1022_v7, %v1021_v6 }
 0x109   :  { %1531 = vmatpush1.bf16.msra.mxu1 %v1530_v16  ;;  %1341 = vmatprep.subr.bf16.mxu0 %v1340_v17  ;;  %v451_v16 = vld [vmem:[#allocation5 + $0xad0] sm:$0xff]  ;;  %v1552_v17 = vpack.c.bf16 %v456_v10, %v452_v9  ;;  %v1362_v23 = vpack.c.bf16 %v453_v15, %v449_v14  ;;  %v1812_v9 = vmov 0.0|0.0   ;;  %v1023_v10 = vld [vmem:[%s2018_s5 + $0x10] sm:$0xff]  ;;  %v1026_v14 = vld [vmem:[%s2018_s5 + $0x28] sm:$0xff] }
 0x10a   :  { %1533 = vmatprep.subr.bf16.mxu1 %v1532_v21  ;;  %v460_v21 = vld [vmem:[#allocation5 + $0xb18] sm:$0xff]  ;;  %v1554_v24 = vpack.c.bf16 %v455_v18, %v451_v16  ;;  %v1027_v16 = vld [vmem:[%s2018_s5 + $0x30] sm:$0xff] }
 0x10c   :  { %1343 = vmatpush1.bf16.msra.mxu0 %v1342_v27  ;;  %v461_v27 = vld [vmem:[#allocation5 + $0xb20] sm:$0xff] }
 0x10d   :  { %1535 = vmatpush1.bf16.msra.mxu1 %v1534_v28  ;;  %1345 = vmatprep.subr.bf16.mxu0 %v1344_v29  ;;  %v459_v28 = vld [vmem:[#allocation5 + $0xb10] sm:$0xff]  ;;  %v1556_v29 = vpack.c.bf16 %v464_v22, %v460_v21  ;;  %v1366_v35 = vpack.c.bf16 %v461_v27, %v457_v26  ;;  %v1814_v21 = vmov 0.0   ;;  %v1585_v22 = vpack.c.bf16 %v1030_v20, %v1029_v19  ;;  %v1034_v27 = vld [vmem:[%s2018_s5 + $0x68] sm:$0xff] }
 0x10e   :  { %1537 = vmatprep.subr.bf16.mxu1 %v1536_v33  ;;  %v468_v33 = vld [vmem:[#allocation5 + $0xb58] sm:$0xff]  ;;  %v1558_v36 = vpack.c.bf16 %v463_v30, %v459_v28  ;;  %v1033_v26 = vld [vmem:[%s2018_s5 + $0x60] sm:$0xff]  ;;  %v1036_v30 = vld [vmem:[%s2018_s5 + $0x78] sm:$0xff] }
 0x10f   :  { %v1591_v28 = vpack.c.bf16 %v1034_v27, %v1033_v26 }
 0x110   :  { %1347 = vmatpush1.bf16.msra.mxu0 %v1346_v39  ;;  %v469_v39 = vld [vmem:[#allocation5 + $0xb60] sm:$0xff] }
 0x111   :  { %1539 = vmatpush1.bf16.msra.mxu1 %v1538_v40  ;;  %1349 = vmatprep.subr.bf16.mxu0 %v1348_v41  ;;  %v467_v40 = vld [vmem:[#allocation5 + $0xb50] sm:$0xff]  ;;  %v1560_v41 = vpack.c.bf16 %v472_v34, %v468_v33  ;;  %v1370_v47 = vpack.c.bf16 %v469_v39, %v465_v38  ;;  %v1976_v33 = vshrl.u32 %v491_v32, 7 }
 0x112   :  { %1541 = vmatprep.subr.bf16.mxu1 %v1540_v45  ;;  %v476_v45 = vld [vmem:[#allocation5 + $0xb98] sm:$0xff]  ;;  %v1562_v48 = vpack.c.bf16 %v471_v42, %v467_v40 }
 0x113   :  { %v493_v34 = vsub.s32 0, %v1976_v33  ;;  %v505_v40 = vsub.s32 3, %v1976_v33  ;;  %vm982_vm1 = vcmp.ge.s32.totalorder %v1976_v33, 3  ;;  %vm983_vm2 = vcmp.lt.s32.totalorder %v1976_v33, 6 }
 0x114   :  { %1351 = vmatpush1.bf16.msra.mxu0 %v1350_v51  ;;  %v477_v51 = vld [vmem:[#allocation5 + $0xba0] sm:$0xff]  ;;  %vm946_vm3 = vcmp.lt.s32.totalorder %v1976_v33, 3  ;;  %vm1987_vm4 = vmand %vm982_vm1, %vm983_vm2 }
 0x115   :  { %1543 = vmatpush1.bf16.msra.mxu1 %v1542_v52  ;;  %1353 = vmatprep.subr.bf16.mxu0 %v1352_v53  ;;  %v475_v52 = vld [vmem:[#allocation5 + $0xb90] sm:$0xff]  ;;  %v1564_v53 = vpack.c.bf16 %v480_v46, %v476_v45  ;;  %v1374_v59 = vpack.c.bf16 %v477_v51, %v473_v50 }
 0x116   :  { %1545 = vmatprep.subr.bf16.mxu1 %v1544_v57  ;;  %v484_v57 = vld [vmem:[#allocation5 + $0xbd8] sm:$0xff]  ;;  %v1566_v60 = vpack.c.bf16 %v479_v54, %v475_v52  ;;  %v1135_v54 = vld [vmem:[#allocation11] ss:$0 sm:$0xff] }
 0x118   :  { %1355 = vmatpush1.bf16.msra.mxu0 %v1354_v63  ;;  %v485_v63 = vld [vmem:[#allocation5 + $0xbe0] sm:$0xff] }
 0x119   :  { %1547 = vmatpush1.bf16.msra.mxu1 %v1546_v0  ;;  %1357 = vmatprep.subr.bf16.mxu0 %v1356_v1  ;;  %v1568_v0 = vpack.c.bf16 %v488_v58, %v484_v57  ;;  %v483_v1 = vld [vmem:[#allocation5 + $0xbd0] sm:$0xff]  ;;  %v1378_v3 = vpack.c.bf16 %v485_v63, %v481_v62 }
 0x11a   :  { %1549 = vmatprep.subr.bf16.mxu1 %v1548_v5  ;;  %v1570_v4 = vpack.c.bf16 %v487_v2, %v483_v1  ;;  %v103_v5 = vld [vmem:[#allocation2 + $0x20] sm:$0xff] }
 0x11c   :  { %1359 = vmatpush1.bf16.msra.mxu0 %v1358_v11  ;;  %v1024_v11 = vld [vmem:[%s2018_s5 + $0x18] sm:$0xff] }
 0x11d   :  { %1551 = vmatpush1.bf16.msra.mxu1 %v1550_v12  ;;  %1361 = vmatprep.subr.bf16.mxu0 %v1360_v13  ;;  %v1576_v12 = vpack.c.bf16 %v1024_v11, %v1023_v10  ;;  %v1025_v13 = vld [vmem:[%s2018_s5 + $0x20] sm:$0xff]  ;;  %v1134_v11 = vld [vmem:[#allocation8] ss:$0 sm:$0xff] }
 0x11e   :  { %1553 = vmatprep.subr.bf16.mxu1 %v1552_v17  ;;  %v1579_v15 = vpack.c.bf16 %v1026_v14, %v1025_v13  ;;  %v1028_v17 = vld [vmem:[%s2018_s5 + $0x38] sm:$0xff] }
 0x11f   :  { %v1582_v18 = vpack.c.bf16 %v1028_v17, %v1027_v16 }
 0x120   :  { %1363 = vmatpush1.bf16.msra.mxu0 %v1362_v23  ;;  %v1031_v23 = vld [vmem:[%s2018_s5 + $0x50] sm:$0xff] }
 0x121   :  { %1555 = vmatpush1.bf16.msra.mxu1 %v1554_v24  ;;  %1365 = vmatprep.subr.bf16.mxu0 %v1364_v25  ;;  %v1032_v24 = vld [vmem:[%s2018_s5 + $0x58] sm:$0xff] }
 0x122   :  { %1557 = vmatprep.subr.bf16.mxu1 %v1556_v29  ;;  %v1588_v25 = vpack.c.bf16 %v1032_v24, %v1031_v23  ;;  %v1035_v29 = vld [vmem:[%s2018_s5 + $0x70] sm:$0xff]  ;;  %s1815_s5 = smov [#allocation13]  }
 0x123   :  { %v1594_v31 = vpack.c.bf16 %v1036_v30, %v1035_v29  ;;  %s1122_s18 = sshll.u32 %s1815_s5, 4  ;;  %s1123_s18 = int_to_ptr.vmem [resolvable:$true] %s1122_s18 }
 0x124   :  { %1367 = vmatpush1.bf16.msra.mxu0 %v1366_v35  ;;  %v489_v35 = vld [vmem:[#allocation7] sm:$0xf]  ;;  %s1772_s25 = scalar_lea.vmem %s1123_s18, 32  ;;  %p1777_p7 = scmp.lt.s32.totalorder %s1123_s18, %s1123_s18 }
 0x125   :  { %1559 = vmatpush1.bf16.msra.mxu1 %v1558_v36  ;;  %1369 = vmatprep.subr.bf16.mxu0 %v1368_v37  ;;  %v497_v36 = vsub.s32 1, %v1976_v33  ;;  %v501_v37 = vsub.s32 2, %v1976_v33  ;;  %v494_v38 = vrot.slane %v489_v35, %v493_v34  ;;  %p1773_p6 = scmp.ne.s32.totalorder %s1123_s18, %s1772_s25  ;;  %p1778_p8 = scmp.lt.s32.totalorder %s1772_s25, %s1772_s25 }
 0x126   :  { %1561 = vmatprep.subr.bf16.mxu1 %v1560_v41 }
 0x127   :  { %v498_v39 = vrot.slane %v489_v35, %v497_v36  ;;  %v502_v42 = vrot.slane %v489_v35, %v501_v37  ;;  %p1779_p9 = por %p1778_p8, %p1777_p7 }
 0x128   :  { %1371 = vmatpush1.bf16.msra.mxu0 %v1370_v47  ;;  %v506_v47 = vrot.slane %v489_v35, %v505_v40  ;;  %v942_v40 = vld [vmem:[#allocation10] sm:$0x1] }
 0x129   :  { %1563 = vmatpush1.bf16.msra.mxu1 %v1562_v48  ;;  %1373 = vmatprep.subr.bf16.mxu0 %v1372_v49  ;;  %p1780_p10 = pnand %p1779_p9, %p1773_p6 }
 0x12a   :  { %1565 = vmatprep.subr.bf16.mxu1 %v1564_v53 }
 0x12c   :  { %1375 = vmatpush1.bf16.msra.mxu0 %v1374_v59 }
 0x12d   :  { %1567 = vmatpush1.bf16.msra.mxu1 %v1566_v60  ;;  %1377 = vmatprep.subr.bf16.mxu0 %v1376_v61 }
 0x12e   :  { %1569 = vmatprep.subr.bf16.mxu1 %v1568_v0 }
 0x130   :  { %1379 = vmatpush1.bf16.msra.mxu0 %v1378_v3 }
 0x131   :  { %1571 = vmatpush1.bf16.msra.mxu1 %v1570_v4  ;;  %1572 = vmatprep.subr.bf16.mxu0 %v1812_v9 }
 0x133   :  { %718 = vmatmul.mubr.f32.vlgmr.msra.gmra.mrb[0].mxu0 %v103_v5 }
 0x134   :  { %931 = vmatmul.mubr.f32.vlgmr.msra.gmra.mrb[0].mxu1 %v103_v5  ;;  %1574 = vmatpush3.bf16.msra.mxu0 %v1573_v8 }
 0x135   :  { %1575 = vmatprep.subr.bf16.mxu0 %v1812_v9  ;;  %1185 = vmatprep.mubr.msk.f32.mxu0 %vm1813_vm0, %v1814_v21 }
 0x138   :  { %1577 = vmatpush3.bf16.msra.mxu0 %v1576_v12 }
 0x139   :  { %1578 = vmatprep.subr.bf16.mxu0 %v1812_v9 }
 0x13c   :  { %1580 = vmatpush3.bf16.msra.mxu0 %v1579_v15 }
 0x13d   :  { %1581 = vmatprep.subr.bf16.mxu0 %v1812_v9 }
 0x140   :  { %1583 = vmatpush3.bf16.msra.mxu0 %v1582_v18 }
 0x141   :  { %1584 = vmatprep.subr.bf16.mxu0 %v1812_v9 }
 0x144   :  { %1586 = vmatpush3.bf16.msra.mxu0 %v1585_v22 }
 0x145   :  { %1587 = vmatprep.subr.bf16.mxu0 %v1812_v9 }
 0x148   :  { %1589 = vmatpush3.bf16.msra.mxu0 %v1588_v25 }
 0x149   :  { %1590 = vmatprep.subr.bf16.mxu0 %v1812_v9 }
 0x14c   :  { %1592 = vmatpush3.bf16.msra.mxu0 %v1591_v28 }
 0x14d   :  { %1593 = vmatprep.subr.bf16.mxu0 %v1812_v9 }
 0x150   :  { %1595 = vmatpush3.bf16.msra.mxu0 %v1594_v31 }
 0x206   :  { %v719_v41 = vpop.f32.mrb[0].mxu0 }
 0x207   :  { %v1596_v43 = vadd.f32 %v719_v41, %v494_v38  ;;  %v932_v44 = vpop.f32.mrb[0].mxu1  ;;  %v721_v45 = vpop.f32.mrb[1].mxu0 }
 0x208   :  { %v1597_v46 = vadd.f32 %v721_v45, %v498_v39  ;;  %v934_v48 = vpop.f32.mrb[1].mxu1  ;;  %v1598_v49 = vadd.f32 %v932_v44, %v502_v42 }
 0x209   :  { %v1599_v51 = vadd.f32 %v934_v48, %v506_v47 }
 0x20a   :  { %v937_v50 = vmax.f32 %v1596_v43, %v1597_v46 }
 0x20c   :  { %v938_v52 = vmax.f32 %v937_v50, %v1598_v49 }
 0x20e   :  { %v939_v53 = vmax.f32 %v938_v52, %v1599_v51 }
 0x210   :  { %v940_v55 = vand.u32 2147483647, %v939_v53 }
 0x212   :  { %v948_v56 = vsel %vm946_vm3, %v940_v55, -inf  ;;  %v985_v57 = vsel %vm1987_vm4, %v940_v55, -inf }
 0x213   :  { %v949_v58 = vrot.slane %v948_v56, 4  ;;  %v986_v59 = vrot.slane %v985_v57, 4 }
 0x215   :  { %v950_v60 = vmax.f32 %v948_v56, %v949_v58  ;;  %v987_v61 = vmax.f32 %v985_v57, %v986_v59 }
 0x217   :  { %v988_v62 = vrot.slane %v987_v61, 2  ;;  %v951_v63 = vrot.slane %v950_v60, 2 }
 0x219   :  { %v989_v0 = vmax.f32 %v987_v61, %v988_v62  ;;  %v952_v1 = vmax.f32 %v950_v60, %v951_v63 }
 0x21b   :  { %v990_v2 = vrot.slane %v989_v0, 1  ;;  %v953_v3 = vrot.slane %v952_v1, 1 }
 0x21d   :  { %v991_v4 = vmax.f32 %v989_v0, %v990_v2  ;;  %v954_v5 = vmax.f32 %v952_v1, %v953_v3 }
 0x21f   :  { %1620 = vrcp.f32 %v991_v4 }
 0x220   :  { %1622 = vrcp.f32 %v954_v5 }
 0x229   :  { %v1621_v6 = vpop.eup %1620 }
 0x22a   :  { %v1623_v7 = vpop.eup %1622  ;;  %v993_v8 = vmul.f32 %v1621_v6, %v940_v55 }
 0x22b   :  { %v956_v9 = vmul.f32 %v1623_v7, %v940_v55 }
 0x22c   :  { %1624 = vlog2.f32 %v993_v8 }
 0x22d   :  { %1626 = vlog2.f32 %v956_v9 }
 0x236   :  { %v1625_v10 = vpop.eup %1624 }
 0x237   :  { %v1627_v12 = vpop.eup %1626  ;;  %v995_v13 = vmul.f32 0.6931472, %v1625_v10 }
 0x238   :  { %v958_v14 = vmul.f32 0.6931472, %v1627_v12 }
 0x239   :  { %v996_v15 = vmul.f32 %v1134_v11, %v995_v13 }
 0x23a   :  { %v965_v16 = vmul.f32 %v1134_v11, %v958_v14 }
 0x23b   :  { %v997_v17 = vmul.f32 1.442695, %v996_v15 }
 0x23c   :  { %v966_v18 = vmul.f32 1.442695, %v965_v16 }
 0x23d   :  { %1628 = vpow2.f32 %v997_v17 }
 0x23e   :  { %1630 = vpow2.f32 %v966_v18 }
 0x247   :  { %v1629_v19 = vpop.eup %1628 }
 0x248   :  { %v1631_v20 = vpop.eup %1630  ;;  %v999_v21 = vsel %vm1987_vm4, %v1629_v19, 0.0 }
 0x249   :  { %v1000_v22 = vrot.slane %v999_v21, 4  ;;  %v968_v23 = vsel %vm946_vm3, %v1631_v20, 0.0 }
 0x24a   :  { %v969_v24 = vrot.slane %v968_v23, 4 }
 0x24b   :  { %v1001_v25 = vadd.f32 %v1000_v22, %v999_v21 }
 0x24c   :  { %v970_v26 = vadd.f32 %v969_v24, %v968_v23 }
 0x24d   :  { %v1002_v27 = vrot.slane %v1001_v25, 2 }
 0x24e   :  { %v971_v28 = vrot.slane %v970_v26, 2 }
 0x24f   :  { %v1003_v29 = vadd.f32 %v1002_v27, %v1001_v25 }
 0x250   :  { %v972_v30 = vadd.f32 %v971_v28, %v970_v26 }
 0x251   :  { %v1004_v31 = vrot.slane %v1003_v29, 1 }
 0x252   :  { %v973_v32 = vrot.slane %v972_v30, 1 }
 0x253   :  { %v1005_v35 = vadd.f32 %v1004_v31, %v1003_v29 }
 0x254   :  { %v974_v36 = vadd.f32 %v973_v32, %v972_v30 }
 0x255   :  { %v1006_v37 = vmul.f32 0.33333334, %v1005_v35 }
 0x256   :  { %v975_v38 = vmul.f32 0.33333334, %v974_v36 }
 0x257   :  { %1632 = vlog2.f32 %v1006_v37 }
 0x258   :  { %1634 = vlog2.f32 %v975_v38 }
 0x261   :  { %v1633_v39 = vpop.eup %1632 }
 0x262   :  { %v1635_v41 = vpop.eup %1634  ;;  %v1008_v42 = vmul.f32 0.6931472, %v1633_v39 }
 0x263   :  { %v977_v43 = vmul.f32 0.6931472, %v1635_v41 }
 0x264   :  { %v1009_v44 = vmul.f32 %v1008_v42, %v942_v40 }
 0x265   :  { %v978_v45 = vmul.f32 %v977_v43, %v942_v40 }
 0x266   :  { %v1010_v46 = vmul.f32 1.442695, %v1009_v44 }
 0x267   :  { %v979_v47 = vmul.f32 1.442695, %v978_v45 }
 0x268   :  { %1636 = vpow2.f32 %v1010_v46 }
 0x269   :  { %1638 = vpow2.f32 %v979_v47 }
 0x272   :  { %v1637_v48 = vpop.eup %1636 }
 0x273   :  { %v1639_v49 = vpop.eup %1638  ;;  %v1012_v50 = vmul.f32 %v1637_v48, %v991_v4 }
 0x274   :  { %v981_v51 = vmul.f32 %v1639_v49, %v954_v5 }
 0x275   :  { %v1017_v52 = vrot.slane %v1012_v50, %v493_v34 }
 0x277   :  { %v1020_v53 = vsel %vm1019_vm5, %v981_v51, %v1017_v52 }
 0x278   :  { %1186 = vmatmul.mubr.f32.vlgmr.msra.gmra.mrb[2].mxu0 %v1020_v53 }
 0x34b   :  { %v1110_v55 = vpop.f32.mrb[2].mxu0 }
 0x34c   :  { %v1111_v56 = vadd.f32 %v1135_v54, %v1110_v55  ;;  %v1187_v57 = vpop.f32.mrb[3].mxu0 }
 0x34e   :  { %1115 = vst.msk [vmem:[#allocation13] sm:$0x3] %vm1114_vm6, %v1111_v56 }
 0x34f   :  { %1783 = shalt.err (!%p1780_p10)
}
 0x350   :  { %s1784_s29 = scalar_lea.hbm %s2020_s7, 32 }
 0x351   :  { %p1785_p11 = scmp.ne.s32.totalorder %s2020_s7, %s1784_s29  ;;  %p1788_p12 = scmp.lt.u32.totalorder %s1784_s29, %s2020_s7 }
 0x353   :  { %p1790_p13 = pnand %p1788_p12, %p1785_p11 }
 0x355   :  { %1793 = shalt.err (!%p1790_p13)
}
 0x356   :  { %1125 = dma.vmem_to_hbm [thread:$0]  %s1123_s18, 32, %s2020_s7, [#allocation4]  }
 0x357   :  { %1802 = dma.done.wait [#allocation4], 32  }
 0x358   :  { %1803 = vsyncadd [#allocation4], 4294967264 }
 0x359   :  { %1129 = vsyncpa [#allocation3], 1 }
 0x35a   :  { %1130 = vsyncpa [#allocation6], 1 }
 0x35b   :  { %1131 = vsyncpa [#allocation9], 1 }
 0x35c   :  { %1132 = vsyncpa [#allocation12], 1 }
 0x35d   :  { %1133 = vsyncpa [#allocation4], 1 }

</bundles_post_ra>
